<compile_context>
chip_gen: v7x
topology: tpu7x:2x2x1
jax: 0.10.0
libtpu: 0.0.40
codegen_flags: <defaults>
</compile_context>

<pallas_src>
import jax
import jax.numpy as jnp
from jax import lax
from jax.experimental import pallas as pl
from jax.experimental.pallas import tpu as pltpu


def _make_lstm_kernel(T, B, H):
    fourH = 4 * H

    def kernel(x_ref, wih1_ref, b1_ref, whh1p_ref, w2p_ref, b2_ref,
               wfc_ref, bfc_ref, out_ref):
        # ---- load every weight exactly once; resident for the whole sequence
        wih1 = wih1_ref[...]      # (D, 4H)   gate columns packed [f, g, o, i]
        b1 = b1_ref[...]          # (1, 4H)   packed, b_ih + b_hh
        whh1p = whh1p_ref[...]    # (4H, 4H)  rows H:4H are zero
        w2p = w2p_ref[...]        # (8H, 4H)  only rows 0:H and 4H:5H nonzero
        b2 = b2_ref[...]          # (1, 4H)   packed
        wfc = wfc_ref[...]        # (1, 4H)   zero beyond lane H
        bfc = bfc_ref[...]        # (1, 1)

        # ---- hoisted layer-1 input projection for ALL timesteps at once ----
        xp = jnp.dot(x_ref[...], wih1,
                     preferred_element_type=jnp.float32) + b1      # (T*B, 4H)

        # lane mask marking the g-gate (tanh) window [H, 2H) — computed once.
        lane = lax.broadcasted_iota(jnp.int32, (B, fourH), 1)
        g_window = (lane >= H) & (lane < 2 * H)

        def cell(gates, c):
            # gates: (B, 4H) packed [f|g|o|i]; c: (B, 4H), valid in lanes 0:H.
            # Full-vreg EUP activations + lane-mask select (no lane slicing).
            act = jnp.where(g_window, jnp.tanh(gates), jax.nn.sigmoid(gates))
            # Rotate copies so f, i, o, g each land in lanes 0:H. With the
            # [f,g,o,i] packing this is correct for either roll-direction
            # convention (a flip only exchanges i and g; i*g commutes).
            f_a = act
            i_a = pltpu.roll(act, H, axis=1)
            o_a = pltpu.roll(act, 2 * H, axis=1)
            g_a = pltpu.roll(act, 3 * H, axis=1)
            c_new = f_a * c + i_a * g_a          # valid in lanes 0:H
            h_new = o_a * jnp.tanh(c_new)        # valid in lanes 0:H
            return h_new, c_new                  # lanes H:4H: bounded junk,
                                                 # killed by zero weight rows

        zero = jnp.zeros((B, fourH), jnp.float32)
        h1, c1, h2, c2 = zero, zero, zero, zero

        for t in range(T):                       # T is small -> static unroll
            xp_t = xp[t * B:(t + 1) * B, :]      # (B, 4H) hoisted input proj
            # layer 1: only the recurrent matmul is on the serial path
            g1 = xp_t + jnp.dot(h1, whh1p, preferred_element_type=jnp.float32)
            h1, c1 = cell(g1, c1)
            # layer 2: single fused input+hidden matmul
            inp2 = jnp.concatenate([h1, h2], axis=-1)            # (B, 8H)
            g2 = jnp.dot(inp2, w2p, preferred_element_type=jnp.float32) + b2
            h2, c2 = cell(g2, c2)

        # final Linear(H, 1): VPU multiply + XLU cross-lane reduce (no MXU)
        out_ref[...] = jnp.sum(h2 * wfc, axis=-1, keepdims=True) + bfc

    return kernel


def stock_price_lstm_forward(x_btd, kp):
    """x_btd: (B, T, D) float32 (batch_first, as in the PyTorch module)."""
    B, T, D = x_btd.shape
    H = kp["wfc_pad"].shape[1] // 4

    # (B, T, D) -> (T*B, D) so row index = t*B + b (matches in-kernel slicing).
    x_flat = jnp.transpose(x_btd, (1, 0, 2)).reshape(T * B, D)

    kernel = _make_lstm_kernel(T, B, H)
    vmem_specs = [pl.BlockSpec(memory_space=pltpu.MemorySpace.VMEM)
                  for _ in range(8)]
    return pl.pallas_call(
        kernel,
        out_shape=jax.ShapeDtypeStruct((B, 1), jnp.float32),
        in_specs=vmem_specs,
        out_specs=pl.BlockSpec(memory_space=pltpu.MemorySpace.VMEM),
    )(x_flat, kp["wih1_t"], kp["b1"], kp["whh1_pad"], kp["w2_pad"],
      kp["b2"], kp["wfc_pad"], kp["bfc"])


def init_params(key, input_size, hidden_size):
    """PyTorch-style U(-1/sqrt(H), 1/sqrt(H)) params + kernel-packed versions."""
    H, D = hidden_size, input_size
    k = 1.0 / jnp.sqrt(jnp.float32(H))
    keys = jax.random.split(key, 10)

    def u(kk, shape):
        return jax.random.uniform(kk, shape, jnp.float32, -k, k)

    # Native PyTorch shapes (gate row order i, f, g, o)
    w_ih1 = u(keys[0], (4 * H, D))
    w_hh1 = u(keys[1], (4 * H, H))
    b_ih1 = u(keys[2], (4 * H,))
    b_hh1 = u(keys[3], (4 * H,))
    w_ih2 = u(keys[4], (4 * H, H))
    w_hh2 = u(keys[5], (4 * H, H))
    b_ih2 = u(keys[6], (4 * H,))
    b_hh2 = u(keys[7], (4 * H,))
    w_fc = u(keys[8], (1, H))
    b_fc = u(keys[9], (1,))

    native = dict(w_ih1=w_ih1, w_hh1=w_hh1, b_ih1=b_ih1, b_hh1=b_hh1,
                  w_ih2=w_ih2, w_hh2=w_hh2, b_ih2=b_ih2, b_hh2=b_hh2,
                  w_fc=w_fc, b_fc=b_fc)

    def pack(x):
        # Repack the 4H gate axis from PyTorch [i, f, g, o] to [f, g, o, i]
        # (cyclic left rotate by one H-block) along the last axis.
        return jnp.roll(x, -H, axis=-1)

    zeros3 = jnp.zeros((3 * H, 4 * H), jnp.float32)
    kernel_params = dict(
        wih1_t=pack(w_ih1.T),                                    # (D, 4H)
        b1=pack(b_ih1 + b_hh1)[None, :],                         # (1, 4H)
        # recurrent weight padded so a full-width (B, 4H) h state (junk in
        # lanes H:4H) can be used directly: zero rows kill the junk lanes.
        whh1_pad=jnp.concatenate([pack(w_hh1.T), zeros3], axis=0),          # (4H, 4H)
        # fused layer-2 weight for the concatenated [h1 | h2] (B, 8H) operand.
        w2_pad=jnp.concatenate([pack(w_ih2.T), zeros3,
                                pack(w_hh2.T), zeros3], axis=0),            # (8H, 4H)
        b2=pack(b_ih2 + b_hh2)[None, :],                         # (1, 4H)
        wfc_pad=jnp.concatenate([w_fc, jnp.zeros((1, 3 * H), jnp.float32)],
                                axis=1),                         # (1, 4H)
        bfc=b_fc[None, :],                                       # (1, 1)
    )
    return native, kernel_params


def reference_forward(x_btd, p):
    """Pure-JAX reference of the PyTorch forward (for correctness check)."""
    B, T, D = x_btd.shape
    H = p["w_hh1"].shape[1]

    def cell(x_t, h, c, w_ih, w_hh, b_ih, b_hh):
        gates = x_t @ w_ih.T + b_ih + h @ w_hh.T + b_hh
        i = jax.nn.sigmoid(gates[:, 0:H])
        f = jax.nn.sigmoid(gates[:, H:2 * H])
        g = jnp.tanh(gates[:, 2 * H:3 * H])
        o = jax.nn.sigmoid(gates[:, 3 * H:4 * H])
        c = f * c + i * g
        h = o * jnp.tanh(c)
        return h, c

    h1 = c1 = h2 = c2 = jnp.zeros((B, H), jnp.float32)
    for t in range(T):
        x_t = x_btd[:, t, :]
        h1, c1 = cell(x_t, h1, c1, p["w_ih1"], p["w_hh1"], p["b_ih1"], p["b_hh1"])
        h2, c2 = cell(h1, h2, c2, p["w_ih2"], p["w_hh2"], p["b_ih2"], p["b_hh2"])
    return h2 @ p["w_fc"].T + p["b_fc"]


if __name__ == "__main__":
    # Small shapes consistent with the module: batch=2, seq=8, input_size=4,
    # hidden=32 (4H = 128 = one full lane width).
    B, T, D, H = 2, 8, 4, 32

    key = jax.random.PRNGKey(0)
    k_x, k_p = jax.random.split(key)
    x = jax.random.normal(k_x, (B, T, D), jnp.float32)

    native_params, kernel_params = init_params(k_p, D, H)

    out = stock_price_lstm_forward(x, kernel_params)
    out = jax.block_until_ready(out)

    ref = reference_forward(x, native_params)
    assert out.shape == (B, 1)
    assert jnp.allclose(out, ref, atol=1e-4, rtol=1e-4), (out, ref)

    print("KERNEL_OK")
</pallas_src>

<mosaic_0001>
module attributes {stable_mosaic.version = 11 : i64} {
  func.func @kernel(%arg0: memref<16x4xf32, #tpu.memory_space<vmem>>, %arg1: memref<4x128xf32, #tpu.memory_space<vmem>>, %arg2: memref<1x128xf32, #tpu.memory_space<vmem>>, %arg3: memref<128x128xf32, #tpu.memory_space<vmem>>, %arg4: memref<256x128xf32, #tpu.memory_space<vmem>>, %arg5: memref<1x128xf32, #tpu.memory_space<vmem>>, %arg6: memref<1x128xf32, #tpu.memory_space<vmem>>, %arg7: memref<1x1xf32, #tpu.memory_space<vmem>>, %arg8: memref<2x1xf32, #tpu.memory_space<vmem>>) attributes {dimension_semantics = [], scalar_prefetch = 0 : i64, scratch_operands = 0 : i64, tpu.core_type = #tpu.core_type<tc>} {
    %c0 = arith.constant 0 : index
    %c0_0 = arith.constant 0 : index
    %0 = vector.load %arg1[%c0, %c0_0] : memref<4x128xf32, #tpu.memory_space<vmem>>, vector<4x128xf32>
    %c0_1 = arith.constant 0 : index
    %c0_2 = arith.constant 0 : index
    %1 = vector.load %arg2[%c0_1, %c0_2] : memref<1x128xf32, #tpu.memory_space<vmem>>, vector<1x128xf32>
    %c0_3 = arith.constant 0 : index
    %c0_4 = arith.constant 0 : index
    %2 = vector.load %arg3[%c0_3, %c0_4] : memref<128x128xf32, #tpu.memory_space<vmem>>, vector<128x128xf32>
    %c0_5 = arith.constant 0 : index
    %c0_6 = arith.constant 0 : index
    %3 = vector.load %arg4[%c0_5, %c0_6] : memref<256x128xf32, #tpu.memory_space<vmem>>, vector<256x128xf32>
    %c0_7 = arith.constant 0 : index
    %c0_8 = arith.constant 0 : index
    %4 = vector.load %arg5[%c0_7, %c0_8] : memref<1x128xf32, #tpu.memory_space<vmem>>, vector<1x128xf32>
    %c0_9 = arith.constant 0 : index
    %c0_10 = arith.constant 0 : index
    %5 = vector.load %arg6[%c0_9, %c0_10] : memref<1x128xf32, #tpu.memory_space<vmem>>, vector<1x128xf32>
    %c0_11 = arith.constant 0 : index
    %c0_12 = arith.constant 0 : index
    %6 = vector.load %arg7[%c0_11, %c0_12] : memref<1x1xf32, #tpu.memory_space<vmem>>, vector<1x1xf32>
    %c0_13 = arith.constant 0 : index
    %c0_14 = arith.constant 0 : index
    %7 = vector.load %arg0[%c0_13, %c0_14] : memref<16x4xf32, #tpu.memory_space<vmem>>, vector<16x4xf32>
    %cst = arith.constant dense<0.000000e+00> : vector<16x128xf32>
    %8 = tpu.matmul %7, %0, %cst {dimension_numbers = #tpu.dot_dimension_numbers<[1], [0], [0], [1], [0, 0, 1, 1], [], []>} : vector<16x4xf32>, vector<4x128xf32>, vector<16x128xf32> -> vector<16x128xf32>
    %9 = vector.broadcast %1 : vector<1x128xf32> to vector<16x128xf32>
    %10 = arith.addf %8, %9 : vector<16x128xf32>
    %11 = tpu.iota {dimensions = array<i32: 1>} : vector<2x128xi32>
    %c32_i32 = arith.constant 32 : i32
    %12 = vector.broadcast %c32_i32 : i32 to vector<2x128xi32>
    %13 = arith.cmpi sge, %11, %12 : vector<2x128xi32>
    %c64_i32 = arith.constant 64 : i32
    %14 = vector.broadcast %c64_i32 : i32 to vector<2x128xi32>
    %15 = arith.cmpi slt, %11, %14 : vector<2x128xi32>
    %16 = arith.andi %13, %15 : vector<2x128xi1>
    %cst_15 = arith.constant 0.000000e+00 : f32
    %17 = vector.broadcast %cst_15 : f32 to vector<2x128xf32>
    %18 = vector.extract_strided_slice %10 {offsets = [0, 0], sizes = [2, 128], strides = [1, 1]} : vector<16x128xf32> to vector<2x128xf32>
    %cst_16 = arith.constant dense<0.000000e+00> : vector<2x128xf32>
    %19 = tpu.matmul %17, %2, %cst_16 {dimension_numbers = #tpu.dot_dimension_numbers<[1], [0], [0], [1], [0, 0, 1, 1], [], []>} : vector<2x128xf32>, vector<128x128xf32>, vector<2x128xf32> -> vector<2x128xf32>
    %20 = arith.addf %18, %19 : vector<2x128xf32>
    %21 = math.tanh %20 : vector<2x128xf32>
    %22 = arith.negf %20 : vector<2x128xf32>
    %23 = math.exp %22 : vector<2x128xf32>
    %cst_17 = arith.constant 1.000000e+00 : f32
    %24 = vector.broadcast %cst_17 : f32 to vector<2x128xf32>
    %25 = arith.addf %24, %23 : vector<2x128xf32>
    %26 = arith.divf %24, %25 : vector<2x128xf32>
    %27 = arith.select %16, %21, %26 : vector<2x128xi1>, vector<2x128xf32>
    %c32_i32_18 = arith.constant 32 : i32
    %28 = tpu.dynamic_rotate %27 by %c32_i32_18 dim 1 : vector<2x128xf32>, i32 -> vector<2x128xf32>
    %c64_i32_19 = arith.constant 64 : i32
    %29 = tpu.dynamic_rotate %27 by %c64_i32_19 dim 1 : vector<2x128xf32>, i32 -> vector<2x128xf32>
    %c96_i32 = arith.constant 96 : i32
    %30 = tpu.dynamic_rotate %27 by %c96_i32 dim 1 : vector<2x128xf32>, i32 -> vector<2x128xf32>
    %31 = arith.mulf %27, %17 : vector<2x128xf32>
    %32 = arith.mulf %28, %30 : vector<2x128xf32>
    %33 = arith.addf %31, %32 : vector<2x128xf32>
    %34 = math.tanh %33 : vector<2x128xf32>
    %35 = arith.mulf %29, %34 : vector<2x128xf32>
    %36 = tpu.concatenate %35, %17 in 1 : vector<2x128xf32>, vector<2x128xf32> -> vector<2x256xf32>
    %cst_20 = arith.constant dense<0.000000e+00> : vector<2x128xf32>
    %37 = tpu.matmul %36, %3, %cst_20 {dimension_numbers = #tpu.dot_dimension_numbers<[1], [0], [0], [1], [0, 0, 1, 1], [], []>} : vector<2x256xf32>, vector<256x128xf32>, vector<2x128xf32> -> vector<2x128xf32>
    %38 = vector.broadcast %4 : vector<1x128xf32> to vector<2x128xf32>
    %39 = arith.addf %37, %38 : vector<2x128xf32>
    %40 = math.tanh %39 : vector<2x128xf32>
    %41 = arith.negf %39 : vector<2x128xf32>
    %42 = math.exp %41 : vector<2x128xf32>
    %cst_21 = arith.constant 1.000000e+00 : f32
    %43 = vector.broadcast %cst_21 : f32 to vector<2x128xf32>
    %44 = arith.addf %43, %42 : vector<2x128xf32>
    %45 = arith.divf %43, %44 : vector<2x128xf32>
    %46 = arith.select %16, %40, %45 : vector<2x128xi1>, vector<2x128xf32>
    %c32_i32_22 = arith.constant 32 : i32
    %47 = tpu.dynamic_rotate %46 by %c32_i32_22 dim 1 : vector<2x128xf32>, i32 -> vector<2x128xf32>
    %c64_i32_23 = arith.constant 64 : i32
    %48 = tpu.dynamic_rotate %46 by %c64_i32_23 dim 1 : vector<2x128xf32>, i32 -> vector<2x128xf32>
    %c96_i32_24 = arith.constant 96 : i32
    %49 = tpu.dynamic_rotate %46 by %c96_i32_24 dim 1 : vector<2x128xf32>, i32 -> vector<2x128xf32>
    %50 = arith.mulf %46, %17 : vector<2x128xf32>
    %51 = arith.mulf %47, %49 : vector<2x128xf32>
    %52 = arith.addf %50, %51 : vector<2x128xf32>
    %53 = math.tanh %52 : vector<2x128xf32>
    %54 = arith.mulf %48, %53 : vector<2x128xf32>
    %55 = vector.extract_strided_slice %10 {offsets = [2, 0], sizes = [2, 128], strides = [1, 1]} : vector<16x128xf32> to vector<2x128xf32>
    %cst_25 = arith.constant dense<0.000000e+00> : vector<2x128xf32>
    %56 = tpu.matmul %35, %2, %cst_25 {dimension_numbers = #tpu.dot_dimension_numbers<[1], [0], [0], [1], [0, 0, 1, 1], [], []>} : vector<2x128xf32>, vector<128x128xf32>, vector<2x128xf32> -> vector<2x128xf32>
    %57 = arith.addf %55, %56 : vector<2x128xf32>
    %58 = math.tanh %57 : vector<2x128xf32>
    %59 = arith.negf %57 : vector<2x128xf32>
    %60 = math.exp %59 : vector<2x128xf32>
    %cst_26 = arith.constant 1.000000e+00 : f32
    %61 = vector.broadcast %cst_26 : f32 to vector<2x128xf32>
    %62 = arith.addf %61, %60 : vector<2x128xf32>
    %63 = arith.divf %61, %62 : vector<2x128xf32>
    %64 = arith.select %16, %58, %63 : vector<2x128xi1>, vector<2x128xf32>
    %c32_i32_27 = arith.constant 32 : i32
    %65 = tpu.dynamic_rotate %64 by %c32_i32_27 dim 1 : vector<2x128xf32>, i32 -> vector<2x128xf32>
    %c64_i32_28 = arith.constant 64 : i32
    %66 = tpu.dynamic_rotate %64 by %c64_i32_28 dim 1 : vector<2x128xf32>, i32 -> vector<2x128xf32>
    %c96_i32_29 = arith.constant 96 : i32
    %67 = tpu.dynamic_rotate %64 by %c96_i32_29 dim 1 : vector<2x128xf32>, i32 -> vector<2x128xf32>
    %68 = arith.mulf %64, %33 : vector<2x128xf32>
    %69 = arith.mulf %65, %67 : vector<2x128xf32>
    %70 = arith.addf %68, %69 : vector<2x128xf32>
    %71 = math.tanh %70 : vector<2x128xf32>
    %72 = arith.mulf %66, %71 : vector<2x128xf32>
    %73 = tpu.concatenate %72, %54 in 1 : vector<2x128xf32>, vector<2x128xf32> -> vector<2x256xf32>
    %cst_30 = arith.constant dense<0.000000e+00> : vector<2x128xf32>
    %74 = tpu.matmul %73, %3, %cst_30 {dimension_numbers = #tpu.dot_dimension_numbers<[1], [0], [0], [1], [0, 0, 1, 1], [], []>} : vector<2x256xf32>, vector<256x128xf32>, vector<2x128xf32> -> vector<2x128xf32>
    %75 = vector.broadcast %4 : vector<1x128xf32> to vector<2x128xf32>
    %76 = arith.addf %74, %75 : vector<2x128xf32>
    %77 = math.tanh %76 : vector<2x128xf32>
    %78 = arith.negf %76 : vector<2x128xf32>
    %79 = math.exp %78 : vector<2x128xf32>
    %cst_31 = arith.constant 1.000000e+00 : f32
    %80 = vector.broadcast %cst_31 : f32 to vector<2x128xf32>
    %81 = arith.addf %80, %79 : vector<2x128xf32>
    %82 = arith.divf %80, %81 : vector<2x128xf32>
    %83 = arith.select %16, %77, %82 : vector<2x128xi1>, vector<2x128xf32>
    %c32_i32_32 = arith.constant 32 : i32
    %84 = tpu.dynamic_rotate %83 by %c32_i32_32 dim 1 : vector<2x128xf32>, i32 -> vector<2x128xf32>
    %c64_i32_33 = arith.constant 64 : i32
    %85 = tpu.dynamic_rotate %83 by %c64_i32_33 dim 1 : vector<2x128xf32>, i32 -> vector<2x128xf32>
    %c96_i32_34 = arith.constant 96 : i32
    %86 = tpu.dynamic_rotate %83 by %c96_i32_34 dim 1 : vector<2x128xf32>, i32 -> vector<2x128xf32>
    %87 = arith.mulf %83, %52 : vector<2x128xf32>
    %88 = arith.mulf %84, %86 : vector<2x128xf32>
    %89 = arith.addf %87, %88 : vector<2x128xf32>
    %90 = math.tanh %89 : vector<2x128xf32>
    %91 = arith.mulf %85, %90 : vector<2x128xf32>
    %92 = vector.extract_strided_slice %10 {offsets = [4, 0], sizes = [2, 128], strides = [1, 1]} : vector<16x128xf32> to vector<2x128xf32>
    %cst_35 = arith.constant dense<0.000000e+00> : vector<2x128xf32>
    %93 = tpu.matmul %72, %2, %cst_35 {dimension_numbers = #tpu.dot_dimension_numbers<[1], [0], [0], [1], [0, 0, 1, 1], [], []>} : vector<2x128xf32>, vector<128x128xf32>, vector<2x128xf32> -> vector<2x128xf32>
    %94 = arith.addf %92, %93 : vector<2x128xf32>
    %95 = math.tanh %94 : vector<2x128xf32>
    %96 = arith.negf %94 : vector<2x128xf32>
    %97 = math.exp %96 : vector<2x128xf32>
    %cst_36 = arith.constant 1.000000e+00 : f32
    %98 = vector.broadcast %cst_36 : f32 to vector<2x128xf32>
    %99 = arith.addf %98, %97 : vector<2x128xf32>
    %100 = arith.divf %98, %99 : vector<2x128xf32>
    %101 = arith.select %16, %95, %100 : vector<2x128xi1>, vector<2x128xf32>
    %c32_i32_37 = arith.constant 32 : i32
    %102 = tpu.dynamic_rotate %101 by %c32_i32_37 dim 1 : vector<2x128xf32>, i32 -> vector<2x128xf32>
    %c64_i32_38 = arith.constant 64 : i32
    %103 = tpu.dynamic_rotate %101 by %c64_i32_38 dim 1 : vector<2x128xf32>, i32 -> vector<2x128xf32>
    %c96_i32_39 = arith.constant 96 : i32
    %104 = tpu.dynamic_rotate %101 by %c96_i32_39 dim 1 : vector<2x128xf32>, i32 -> vector<2x128xf32>
    %105 = arith.mulf %101, %70 : vector<2x128xf32>
    %106 = arith.mulf %102, %104 : vector<2x128xf32>
    %107 = arith.addf %105, %106 : vector<2x128xf32>
    %108 = math.tanh %107 : vector<2x128xf32>
    %109 = arith.mulf %103, %108 : vector<2x128xf32>
    %110 = tpu.concatenate %109, %91 in 1 : vector<2x128xf32>, vector<2x128xf32> -> vector<2x256xf32>
    %cst_40 = arith.constant dense<0.000000e+00> : vector<2x128xf32>
    %111 = tpu.matmul %110, %3, %cst_40 {dimension_numbers = #tpu.dot_dimension_numbers<[1], [0], [0], [1], [0, 0, 1, 1], [], []>} : vector<2x256xf32>, vector<256x128xf32>, vector<2x128xf32> -> vector<2x128xf32>
    %112 = vector.broadcast %4 : vector<1x128xf32> to vector<2x128xf32>
    %113 = arith.addf %111, %112 : vector<2x128xf32>
    %114 = math.tanh %113 : vector<2x128xf32>
    %115 = arith.negf %113 : vector<2x128xf32>
    %116 = math.exp %115 : vector<2x128xf32>
    %cst_41 = arith.constant 1.000000e+00 : f32
    %117 = vector.broadcast %cst_41 : f32 to vector<2x128xf32>
    %118 = arith.addf %117, %116 : vector<2x128xf32>
    %119 = arith.divf %117, %118 : vector<2x128xf32>
    %120 = arith.select %16, %114, %119 : vector<2x128xi1>, vector<2x128xf32>
    %c32_i32_42 = arith.constant 32 : i32
    %121 = tpu.dynamic_rotate %120 by %c32_i32_42 dim 1 : vector<2x128xf32>, i32 -> vector<2x128xf32>
    %c64_i32_43 = arith.constant 64 : i32
    %122 = tpu.dynamic_rotate %120 by %c64_i32_43 dim 1 : vector<2x128xf32>, i32 -> vector<2x128xf32>
    %c96_i32_44 = arith.constant 96 : i32
    %123 = tpu.dynamic_rotate %120 by %c96_i32_44 dim 1 : vector<2x128xf32>, i32 -> vector<2x128xf32>
    %124 = arith.mulf %120, %89 : vector<2x128xf32>
    %125 = arith.mulf %121, %123 : vector<2x128xf32>
    %126 = arith.addf %124, %125 : vector<2x128xf32>
    %127 = math.tanh %126 : vector<2x128xf32>
    %128 = arith.mulf %122, %127 : vector<2x128xf32>
    %129 = vector.extract_strided_slice %10 {offsets = [6, 0], sizes = [2, 128], strides = [1, 1]} : vector<16x128xf32> to vector<2x128xf32>
    %cst_45 = arith.constant dense<0.000000e+00> : vector<2x128xf32>
    %130 = tpu.matmul %109, %2, %cst_45 {dimension_numbers = #tpu.dot_dimension_numbers<[1], [0], [0], [1], [0, 0, 1, 1], [], []>} : vector<2x128xf32>, vector<128x128xf32>, vector<2x128xf32> -> vector<2x128xf32>
    %131 = arith.addf %129, %130 : vector<2x128xf32>
    %132 = math.tanh %131 : vector<2x128xf32>
    %133 = arith.negf %131 : vector<2x128xf32>
    %134 = math.exp %133 : vector<2x128xf32>
    %cst_46 = arith.constant 1.000000e+00 : f32
    %135 = vector.broadcast %cst_46 : f32 to vector<2x128xf32>
    %136 = arith.addf %135, %134 : vector<2x128xf32>
    %137 = arith.divf %135, %136 : vector<2x128xf32>
    %138 = arith.select %16, %132, %137 : vector<2x128xi1>, vector<2x128xf32>
    %c32_i32_47 = arith.constant 32 : i32
    %139 = tpu.dynamic_rotate %138 by %c32_i32_47 dim 1 : vector<2x128xf32>, i32 -> vector<2x128xf32>
    %c64_i32_48 = arith.constant 64 : i32
    %140 = tpu.dynamic_rotate %138 by %c64_i32_48 dim 1 : vector<2x128xf32>, i32 -> vector<2x128xf32>
    %c96_i32_49 = arith.constant 96 : i32
    %141 = tpu.dynamic_rotate %138 by %c96_i32_49 dim 1 : vector<2x128xf32>, i32 -> vector<2x128xf32>
    %142 = arith.mulf %138, %107 : vector<2x128xf32>
    %143 = arith.mulf %139, %141 : vector<2x128xf32>
    %144 = arith.addf %142, %143 : vector<2x128xf32>
    %145 = math.tanh %144 : vector<2x128xf32>
    %146 = arith.mulf %140, %145 : vector<2x128xf32>
    %147 = tpu.concatenate %146, %128 in 1 : vector<2x128xf32>, vector<2x128xf32> -> vector<2x256xf32>
    %cst_50 = arith.constant dense<0.000000e+00> : vector<2x128xf32>
    %148 = tpu.matmul %147, %3, %cst_50 {dimension_numbers = #tpu.dot_dimension_numbers<[1], [0], [0], [1], [0, 0, 1, 1], [], []>} : vector<2x256xf32>, vector<256x128xf32>, vector<2x128xf32> -> vector<2x128xf32>
    %149 = vector.broadcast %4 : vector<1x128xf32> to vector<2x128xf32>
    %150 = arith.addf %148, %149 : vector<2x128xf32>
    %151 = math.tanh %150 : vector<2x128xf32>
    %152 = arith.negf %150 : vector<2x128xf32>
    %153 = math.exp %152 : vector<2x128xf32>
    %cst_51 = arith.constant 1.000000e+00 : f32
    %154 = vector.broadcast %cst_51 : f32 to vector<2x128xf32>
    %155 = arith.addf %154, %153 : vector<2x128xf32>
    %156 = arith.divf %154, %155 : vector<2x128xf32>
    %157 = arith.select %16, %151, %156 : vector<2x128xi1>, vector<2x128xf32>
    %c32_i32_52 = arith.constant 32 : i32
    %158 = tpu.dynamic_rotate %157 by %c32_i32_52 dim 1 : vector<2x128xf32>, i32 -> vector<2x128xf32>
    %c64_i32_53 = arith.constant 64 : i32
    %159 = tpu.dynamic_rotate %157 by %c64_i32_53 dim 1 : vector<2x128xf32>, i32 -> vector<2x128xf32>
    %c96_i32_54 = arith.constant 96 : i32
    %160 = tpu.dynamic_rotate %157 by %c96_i32_54 dim 1 : vector<2x128xf32>, i32 -> vector<2x128xf32>
    %161 = arith.mulf %157, %126 : vector<2x128xf32>
    %162 = arith.mulf %158, %160 : vector<2x128xf32>
    %163 = arith.addf %161, %162 : vector<2x128xf32>
    %164 = math.tanh %163 : vector<2x128xf32>
    %165 = arith.mulf %159, %164 : vector<2x128xf32>
    %166 = vector.extract_strided_slice %10 {offsets = [8, 0], sizes = [2, 128], strides = [1, 1]} : vector<16x128xf32> to vector<2x128xf32>
    %cst_55 = arith.constant dense<0.000000e+00> : vector<2x128xf32>
    %167 = tpu.matmul %146, %2, %cst_55 {dimension_numbers = #tpu.dot_dimension_numbers<[1], [0], [0], [1], [0, 0, 1, 1], [], []>} : vector<2x128xf32>, vector<128x128xf32>, vector<2x128xf32> -> vector<2x128xf32>
    %168 = arith.addf %166, %167 : vector<2x128xf32>
    %169 = math.tanh %168 : vector<2x128xf32>
    %170 = arith.negf %168 : vector<2x128xf32>
    %171 = math.exp %170 : vector<2x128xf32>
    %cst_56 = arith.constant 1.000000e+00 : f32
    %172 = vector.broadcast %cst_56 : f32 to vector<2x128xf32>
    %173 = arith.addf %172, %171 : vector<2x128xf32>
    %174 = arith.divf %172, %173 : vector<2x128xf32>
    %175 = arith.select %16, %169, %174 : vector<2x128xi1>, vector<2x128xf32>
    %c32_i32_57 = arith.constant 32 : i32
    %176 = tpu.dynamic_rotate %175 by %c32_i32_57 dim 1 : vector<2x128xf32>, i32 -> vector<2x128xf32>
    %c64_i32_58 = arith.constant 64 : i32
    %177 = tpu.dynamic_rotate %175 by %c64_i32_58 dim 1 : vector<2x128xf32>, i32 -> vector<2x128xf32>
    %c96_i32_59 = arith.constant 96 : i32
    %178 = tpu.dynamic_rotate %175 by %c96_i32_59 dim 1 : vector<2x128xf32>, i32 -> vector<2x128xf32>
    %179 = arith.mulf %175, %144 : vector<2x128xf32>
    %180 = arith.mulf %176, %178 : vector<2x128xf32>
    %181 = arith.addf %179, %180 : vector<2x128xf32>
    %182 = math.tanh %181 : vector<2x128xf32>
    %183 = arith.mulf %177, %182 : vector<2x128xf32>
    %184 = tpu.concatenate %183, %165 in 1 : vector<2x128xf32>, vector<2x128xf32> -> vector<2x256xf32>
    %cst_60 = arith.constant dense<0.000000e+00> : vector<2x128xf32>
    %185 = tpu.matmul %184, %3, %cst_60 {dimension_numbers = #tpu.dot_dimension_numbers<[1], [0], [0], [1], [0, 0, 1, 1], [], []>} : vector<2x256xf32>, vector<256x128xf32>, vector<2x128xf32> -> vector<2x128xf32>
    %186 = vector.broadcast %4 : vector<1x128xf32> to vector<2x128xf32>
    %187 = arith.addf %185, %186 : vector<2x128xf32>
    %188 = math.tanh %187 : vector<2x128xf32>
    %189 = arith.negf %187 : vector<2x128xf32>
    %190 = math.exp %189 : vector<2x128xf32>
    %cst_61 = arith.constant 1.000000e+00 : f32
    %191 = vector.broadcast %cst_61 : f32 to vector<2x128xf32>
    %192 = arith.addf %191, %190 : vector<2x128xf32>
    %193 = arith.divf %191, %192 : vector<2x128xf32>
    %194 = arith.select %16, %188, %193 : vector<2x128xi1>, vector<2x128xf32>
    %c32_i32_62 = arith.constant 32 : i32
    %195 = tpu.dynamic_rotate %194 by %c32_i32_62 dim 1 : vector<2x128xf32>, i32 -> vector<2x128xf32>
    %c64_i32_63 = arith.constant 64 : i32
    %196 = tpu.dynamic_rotate %194 by %c64_i32_63 dim 1 : vector<2x128xf32>, i32 -> vector<2x128xf32>
    %c96_i32_64 = arith.constant 96 : i32
    %197 = tpu.dynamic_rotate %194 by %c96_i32_64 dim 1 : vector<2x128xf32>, i32 -> vector<2x128xf32>
    %198 = arith.mulf %194, %163 : vector<2x128xf32>
    %199 = arith.mulf %195, %197 : vector<2x128xf32>
    %200 = arith.addf %198, %199 : vector<2x128xf32>
    %201 = math.tanh %200 : vector<2x128xf32>
    %202 = arith.mulf %196, %201 : vector<2x128xf32>
    %203 = vector.extract_strided_slice %10 {offsets = [10, 0], sizes = [2, 128], strides = [1, 1]} : vector<16x128xf32> to vector<2x128xf32>
    %cst_65 = arith.constant dense<0.000000e+00> : vector<2x128xf32>
    %204 = tpu.matmul %183, %2, %cst_65 {dimension_numbers = #tpu.dot_dimension_numbers<[1], [0], [0], [1], [0, 0, 1, 1], [], []>} : vector<2x128xf32>, vector<128x128xf32>, vector<2x128xf32> -> vector<2x128xf32>
    %205 = arith.addf %203, %204 : vector<2x128xf32>
    %206 = math.tanh %205 : vector<2x128xf32>
    %207 = arith.negf %205 : vector<2x128xf32>
    %208 = math.exp %207 : vector<2x128xf32>
    %cst_66 = arith.constant 1.000000e+00 : f32
    %209 = vector.broadcast %cst_66 : f32 to vector<2x128xf32>
    %210 = arith.addf %209, %208 : vector<2x128xf32>
    %211 = arith.divf %209, %210 : vector<2x128xf32>
    %212 = arith.select %16, %206, %211 : vector<2x128xi1>, vector<2x128xf32>
    %c32_i32_67 = arith.constant 32 : i32
    %213 = tpu.dynamic_rotate %212 by %c32_i32_67 dim 1 : vector<2x128xf32>, i32 -> vector<2x128xf32>
    %c64_i32_68 = arith.constant 64 : i32
    %214 = tpu.dynamic_rotate %212 by %c64_i32_68 dim 1 : vector<2x128xf32>, i32 -> vector<2x128xf32>
    %c96_i32_69 = arith.constant 96 : i32
    %215 = tpu.dynamic_rotate %212 by %c96_i32_69 dim 1 : vector<2x128xf32>, i32 -> vector<2x128xf32>
    %216 = arith.mulf %212, %181 : vector<2x128xf32>
    %217 = arith.mulf %213, %215 : vector<2x128xf32>
    %218 = arith.addf %216, %217 : vector<2x128xf32>
    %219 = math.tanh %218 : vector<2x128xf32>
    %220 = arith.mulf %214, %219 : vector<2x128xf32>
    %221 = tpu.concatenate %220, %202 in 1 : vector<2x128xf32>, vector<2x128xf32> -> vector<2x256xf32>
    %cst_70 = arith.constant dense<0.000000e+00> : vector<2x128xf32>
    %222 = tpu.matmul %221, %3, %cst_70 {dimension_numbers = #tpu.dot_dimension_numbers<[1], [0], [0], [1], [0, 0, 1, 1], [], []>} : vector<2x256xf32>, vector<256x128xf32>, vector<2x128xf32> -> vector<2x128xf32>
    %223 = vector.broadcast %4 : vector<1x128xf32> to vector<2x128xf32>
    %224 = arith.addf %222, %223 : vector<2x128xf32>
    %225 = math.tanh %224 : vector<2x128xf32>
    %226 = arith.negf %224 : vector<2x128xf32>
    %227 = math.exp %226 : vector<2x128xf32>
    %cst_71 = arith.constant 1.000000e+00 : f32
    %228 = vector.broadcast %cst_71 : f32 to vector<2x128xf32>
    %229 = arith.addf %228, %227 : vector<2x128xf32>
    %230 = arith.divf %228, %229 : vector<2x128xf32>
    %231 = arith.select %16, %225, %230 : vector<2x128xi1>, vector<2x128xf32>
    %c32_i32_72 = arith.constant 32 : i32
    %232 = tpu.dynamic_rotate %231 by %c32_i32_72 dim 1 : vector<2x128xf32>, i32 -> vector<2x128xf32>
    %c64_i32_73 = arith.constant 64 : i32
    %233 = tpu.dynamic_rotate %231 by %c64_i32_73 dim 1 : vector<2x128xf32>, i32 -> vector<2x128xf32>
    %c96_i32_74 = arith.constant 96 : i32
    %234 = tpu.dynamic_rotate %231 by %c96_i32_74 dim 1 : vector<2x128xf32>, i32 -> vector<2x128xf32>
    %235 = arith.mulf %231, %200 : vector<2x128xf32>
    %236 = arith.mulf %232, %234 : vector<2x128xf32>
    %237 = arith.addf %235, %236 : vector<2x128xf32>
    %238 = math.tanh %237 : vector<2x128xf32>
    %239 = arith.mulf %233, %238 : vector<2x128xf32>
    %240 = vector.extract_strided_slice %10 {offsets = [12, 0], sizes = [2, 128], strides = [1, 1]} : vector<16x128xf32> to vector<2x128xf32>
    %cst_75 = arith.constant dense<0.000000e+00> : vector<2x128xf32>
    %241 = tpu.matmul %220, %2, %cst_75 {dimension_numbers = #tpu.dot_dimension_numbers<[1], [0], [0], [1], [0, 0, 1, 1], [], []>} : vector<2x128xf32>, vector<128x128xf32>, vector<2x128xf32> -> vector<2x128xf32>
    %242 = arith.addf %240, %241 : vector<2x128xf32>
    %243 = math.tanh %242 : vector<2x128xf32>
    %244 = arith.negf %242 : vector<2x128xf32>
    %245 = math.exp %244 : vector<2x128xf32>
    %cst_76 = arith.constant 1.000000e+00 : f32
    %246 = vector.broadcast %cst_76 : f32 to vector<2x128xf32>
    %247 = arith.addf %246, %245 : vector<2x128xf32>
    %248 = arith.divf %246, %247 : vector<2x128xf32>
    %249 = arith.select %16, %243, %248 : vector<2x128xi1>, vector<2x128xf32>
    %c32_i32_77 = arith.constant 32 : i32
    %250 = tpu.dynamic_rotate %249 by %c32_i32_77 dim 1 : vector<2x128xf32>, i32 -> vector<2x128xf32>
    %c64_i32_78 = arith.constant 64 : i32
    %251 = tpu.dynamic_rotate %249 by %c64_i32_78 dim 1 : vector<2x128xf32>, i32 -> vector<2x128xf32>
    %c96_i32_79 = arith.constant 96 : i32
    %252 = tpu.dynamic_rotate %249 by %c96_i32_79 dim 1 : vector<2x128xf32>, i32 -> vector<2x128xf32>
    %253 = arith.mulf %249, %218 : vector<2x128xf32>
    %254 = arith.mulf %250, %252 : vector<2x128xf32>
    %255 = arith.addf %253, %254 : vector<2x128xf32>
    %256 = math.tanh %255 : vector<2x128xf32>
    %257 = arith.mulf %251, %256 : vector<2x128xf32>
    %258 = tpu.concatenate %257, %239 in 1 : vector<2x128xf32>, vector<2x128xf32> -> vector<2x256xf32>
    %cst_80 = arith.constant dense<0.000000e+00> : vector<2x128xf32>
    %259 = tpu.matmul %258, %3, %cst_80 {dimension_numbers = #tpu.dot_dimension_numbers<[1], [0], [0], [1], [0, 0, 1, 1], [], []>} : vector<2x256xf32>, vector<256x128xf32>, vector<2x128xf32> -> vector<2x128xf32>
    %260 = vector.broadcast %4 : vector<1x128xf32> to vector<2x128xf32>
    %261 = arith.addf %259, %260 : vector<2x128xf32>
    %262 = math.tanh %261 : vector<2x128xf32>
    %263 = arith.negf %261 : vector<2x128xf32>
    %264 = math.exp %263 : vector<2x128xf32>
    %cst_81 = arith.constant 1.000000e+00 : f32
    %265 = vector.broadcast %cst_81 : f32 to vector<2x128xf32>
    %266 = arith.addf %265, %264 : vector<2x128xf32>
    %267 = arith.divf %265, %266 : vector<2x128xf32>
    %268 = arith.select %16, %262, %267 : vector<2x128xi1>, vector<2x128xf32>
    %c32_i32_82 = arith.constant 32 : i32
    %269 = tpu.dynamic_rotate %268 by %c32_i32_82 dim 1 : vector<2x128xf32>, i32 -> vector<2x128xf32>
    %c64_i32_83 = arith.constant 64 : i32
    %270 = tpu.dynamic_rotate %268 by %c64_i32_83 dim 1 : vector<2x128xf32>, i32 -> vector<2x128xf32>
    %c96_i32_84 = arith.constant 96 : i32
    %271 = tpu.dynamic_rotate %268 by %c96_i32_84 dim 1 : vector<2x128xf32>, i32 -> vector<2x128xf32>
    %272 = arith.mulf %268, %237 : vector<2x128xf32>
    %273 = arith.mulf %269, %271 : vector<2x128xf32>
    %274 = arith.addf %272, %273 : vector<2x128xf32>
    %275 = math.tanh %274 : vector<2x128xf32>
    %276 = arith.mulf %270, %275 : vector<2x128xf32>
    %277 = vector.extract_strided_slice %10 {offsets = [14, 0], sizes = [2, 128], strides = [1, 1]} : vector<16x128xf32> to vector<2x128xf32>
    %cst_85 = arith.constant dense<0.000000e+00> : vector<2x128xf32>
    %278 = tpu.matmul %257, %2, %cst_85 {dimension_numbers = #tpu.dot_dimension_numbers<[1], [0], [0], [1], [0, 0, 1, 1], [], []>} : vector<2x128xf32>, vector<128x128xf32>, vector<2x128xf32> -> vector<2x128xf32>
    %279 = arith.addf %277, %278 : vector<2x128xf32>
    %280 = math.tanh %279 : vector<2x128xf32>
    %281 = arith.negf %279 : vector<2x128xf32>
    %282 = math.exp %281 : vector<2x128xf32>
    %cst_86 = arith.constant 1.000000e+00 : f32
    %283 = vector.broadcast %cst_86 : f32 to vector<2x128xf32>
    %284 = arith.addf %283, %282 : vector<2x128xf32>
    %285 = arith.divf %283, %284 : vector<2x128xf32>
    %286 = arith.select %16, %280, %285 : vector<2x128xi1>, vector<2x128xf32>
    %c32_i32_87 = arith.constant 32 : i32
    %287 = tpu.dynamic_rotate %286 by %c32_i32_87 dim 1 : vector<2x128xf32>, i32 -> vector<2x128xf32>
    %c64_i32_88 = arith.constant 64 : i32
    %288 = tpu.dynamic_rotate %286 by %c64_i32_88 dim 1 : vector<2x128xf32>, i32 -> vector<2x128xf32>
    %c96_i32_89 = arith.constant 96 : i32
    %289 = tpu.dynamic_rotate %286 by %c96_i32_89 dim 1 : vector<2x128xf32>, i32 -> vector<2x128xf32>
    %290 = arith.mulf %286, %255 : vector<2x128xf32>
    %291 = arith.mulf %287, %289 : vector<2x128xf32>
    %292 = arith.addf %290, %291 : vector<2x128xf32>
    %293 = math.tanh %292 : vector<2x128xf32>
    %294 = arith.mulf %288, %293 : vector<2x128xf32>
    %295 = tpu.concatenate %294, %276 in 1 : vector<2x128xf32>, vector<2x128xf32> -> vector<2x256xf32>
    %cst_90 = arith.constant dense<0.000000e+00> : vector<2x128xf32>
    %296 = tpu.matmul %295, %3, %cst_90 {dimension_numbers = #tpu.dot_dimension_numbers<[1], [0], [0], [1], [0, 0, 1, 1], [], []>} : vector<2x256xf32>, vector<256x128xf32>, vector<2x128xf32> -> vector<2x128xf32>
    %297 = vector.broadcast %4 : vector<1x128xf32> to vector<2x128xf32>
    %298 = arith.addf %296, %297 : vector<2x128xf32>
    %299 = math.tanh %298 : vector<2x128xf32>
    %300 = arith.negf %298 : vector<2x128xf32>
    %301 = math.exp %300 : vector<2x128xf32>
    %cst_91 = arith.constant 1.000000e+00 : f32
    %302 = vector.broadcast %cst_91 : f32 to vector<2x128xf32>
    %303 = arith.addf %302, %301 : vector<2x128xf32>
    %304 = arith.divf %302, %303 : vector<2x128xf32>
    %305 = arith.select %16, %299, %304 : vector<2x128xi1>, vector<2x128xf32>
    %c32_i32_92 = arith.constant 32 : i32
    %306 = tpu.dynamic_rotate %305 by %c32_i32_92 dim 1 : vector<2x128xf32>, i32 -> vector<2x128xf32>
    %c64_i32_93 = arith.constant 64 : i32
    %307 = tpu.dynamic_rotate %305 by %c64_i32_93 dim 1 : vector<2x128xf32>, i32 -> vector<2x128xf32>
    %c96_i32_94 = arith.constant 96 : i32
    %308 = tpu.dynamic_rotate %305 by %c96_i32_94 dim 1 : vector<2x128xf32>, i32 -> vector<2x128xf32>
    %309 = arith.mulf %305, %274 : vector<2x128xf32>
    %310 = arith.mulf %306, %308 : vector<2x128xf32>
    %311 = arith.addf %309, %310 : vector<2x128xf32>
    %312 = math.tanh %311 : vector<2x128xf32>
    %313 = arith.mulf %307, %312 : vector<2x128xf32>
    %314 = vector.broadcast %5 : vector<1x128xf32> to vector<2x128xf32>
    %315 = arith.mulf %313, %314 : vector<2x128xf32>
    %cst_95 = arith.constant dense<0.000000e+00> : vector<2xf32>
    %316 = vector.multi_reduction <add>, %315, %cst_95 [1] : vector<2x128xf32> to vector<2xf32>
    %317 = vector.shape_cast %316 : vector<2xf32> to vector<2x1xf32>
    %318 = vector.broadcast %6 : vector<1x1xf32> to vector<2x1xf32>
    %319 = arith.addf %317, %318 : vector<2x1xf32>
    %c0_96 = arith.constant 0 : index
    %c0_97 = arith.constant 0 : index
    %320 = vector.load %arg8[%c0_96, %c0_97] : memref<2x1xf32, #tpu.memory_space<vmem>>, vector<2x1xf32>
    tpu.vector_store %arg8[%c0_96, %c0_97], %319 {strides = array<i32>} : memref<2x1xf32, #tpu.memory_space<vmem>>, vector<2x1xf32>,
    return
  }
}

</mosaic_0001>

<bundles_post_ra>
// kernel: tpu_custom_call.1
= control target key start
LH: loop header
LB: loop body
LE: loop exit
PB: predicated region body
PF: predicated region fallthrough
CT: control target
= control target key end

     0   :  { %s3710_s0 = inlined_call_operand.vmem [shape: f32[16,4], index: 0, kind: input, shape index: {}]   ;;  %s3711_s1 = inlined_call_operand.vmem [shape: f32[4,128], index: 1, kind: input, shape index: {}]   ;;  %s3712_s2 = inlined_call_operand.vmem [shape: f32[1,128], index: 2, kind: input, shape index: {}]   ;;  %s3713_s3 = inlined_call_operand.hbm [shape: f32[128,128], index: 3, kind: input, shape index: {}]   ;;  %s3714_s4 = inlined_call_operand.hbm [shape: f32[256,128], index: 4, kind: input, shape index: {}]   ;;  %s3715_s5 = inlined_call_operand.vmem [shape: f32[1,128], index: 5, kind: input, shape index: {}]   ;;  %s3716_s6 = inlined_call_operand.vmem [shape: f32[1,128], index: 6, kind: input, shape index: {}]   ;;  %s3717_s7 = inlined_call_operand.<no memory space> [shape: f32[1,1], index: 7, kind: input, shape index: {}]   ;;  %s3718_s8 = inlined_call_operand.vmem [shape: f32[2,1], index: 8, kind: output, shape index: {}]  }
   0x1   :  { %v13_v0 = vstv %s3717_s7 }
   0x2   :  { %14 = vst [vmem:[#allocation2] sm:$0x1] %v13_v0 }
   0x3   :  { %15 = vsyncpa [#allocation4], 0 }
   0x4   :  { %16 = vsyncpa [#allocation6], 0  ;;  %s3130_s29 = smov [#allocation3]   ;;  %s3082_s11 = scalar_lea.hbm %s3713_s3, 2048 }
   0x5   :  { %s28_s30 = sshll.u32 %s3130_s29, 4  ;;  %p3083_p0 = scmp.ne.s32.totalorder %s3713_s3, %s3082_s11  ;;  %s29_s30 = int_to_ptr.vmem [resolvable:$true] %s28_s30 }
   0x6   :  { %p3086_p1 = scmp.lt.u32.totalorder %s3082_s11, %s3713_s3 }
   0x8   :  { %p3088_p2 = pnand %p3086_p1, %p3083_p0 }
   0xa   :  { %3091 = shalt.err (!%p3088_p2)
}
   0xb   :  { %s3092_s7 = scalar_lea.vmem %s29_s30, 2048  ;;  %p3097_p4 = scmp.lt.s32.totalorder %s29_s30, %s29_s30 }
   0xc   :  { %p3093_p3 = scmp.ne.s32.totalorder %s29_s30, %s3092_s7  ;;  %p3098_p5 = scmp.lt.s32.totalorder %s3092_s7, %s3092_s7 }
   0xe   :  { %p3099_p6 = por %p3098_p5, %p3097_p4 }
  0x10   :  { %p3100_p7 = pnand %p3099_p6, %p3093_p3 }
  0x12   :  { %3103 = shalt.err (!%p3100_p7)
}
  0x13   :  { %s3131_s16 = smov 128   ;;  %s3132_s17 = smov 8  }
  0x14   :  { %34 = dma.hbm_to_vmem [thread:$0]  %s3713_s3, 2048, %s29_s30, [#allocation4], %s3131_s16, %s3131_s16, %s3132_s17  }
  0x15   :  { %s3133_s20 = smov [#allocation5]   ;;  %s3104_s24 = scalar_lea.hbm %s3714_s4, 4096 }
  0x16   :  { %s40_s21 = sshll.u32 %s3133_s20, 4  ;;  %p3105_p8 = scmp.ne.s32.totalorder %s3714_s4, %s3104_s24  ;;  %s41_s21 = int_to_ptr.vmem [resolvable:$true] %s40_s21 }
  0x17   :  { %p3108_p9 = scmp.lt.u32.totalorder %s3104_s24, %s3714_s4 }
  0x19   :  { %p3110_p10 = pnand %p3108_p9, %p3105_p8 }
  0x1b   :  { %3113 = shalt.err (!%p3110_p10)
}
  0x1c   :  { %s3114_s29 = scalar_lea.vmem %s41_s21, 4096  ;;  %p3119_p12 = scmp.lt.s32.totalorder %s41_s21, %s41_s21 }
  0x1d   :  { %p3115_p11 = scmp.ne.s32.totalorder %s41_s21, %s3114_s29  ;;  %p3120_p13 = scmp.lt.s32.totalorder %s3114_s29, %s3114_s29 }
  0x1f   :  { %p3121_p0 = por %p3120_p13, %p3119_p12 }
  0x21   :  { %p3122_p1 = pnand %p3121_p0, %p3115_p11 }
  0x23   :  { %3125 = shalt.err (!%p3122_p1)
}
  0x24   :  { %46 = dma.hbm_to_vmem [thread:$0]  %s3714_s4, 4096, %s41_s21, [#allocation6], %s3131_s16, %s3131_s16, %s3132_s17  }
  0x25   :  { %3126 = dma.done.wait [#allocation4], 2048  }
  0x26   :  { %3127 = vsyncadd [#allocation4], 4294965248 }
  0x27   :  { %3128 = dma.done.wait [#allocation6], 4096  }
  0x28   :  { %3129 = vsyncadd [#allocation6], 4294963200  ;;  %v3134_v1 = vmov 0.0|0.0   ;;  %vm3135_vm0 = vmmov 0   ;;  %v3136_v2 = vmov 0.0   ;;  %v61_v3 = vld [vmem:[#allocation3] sm:$0xff]  ;;  %v206_v57 = vlaneseq }
  0x29   :  { %2495 = vmatprep.subr.bf16.mxu1 %v3134_v1  ;;  %2247 = vmatprep.mubr.msk.f32.mxu1 %vm3135_vm0, %v3136_v2  ;;  %v62_v4 = vld [vmem:[#allocation3 + $0x8] sm:$0xff]  ;;  %v63_v5 = vld [vmem:[#allocation3 + $0x10] sm:$0xff]  ;;  %v64_v7 = vld [vmem:[#allocation3 + $0x18] sm:$0xff]  ;;  %vm127_vm1 = vcmask 1043456   ;;  %vm120_vm2 = vcmask 31744   ;;  %s3138_s14 = smov 32  }
  0x2a   :  { %v3215_v6 = vpack.c.bf16 %v62_v4, %v61_v3  ;;  %v3218_v8 = vpack.c.bf16 %v64_v7, %v63_v5  ;;  %v65_v9 = vld [vmem:[#allocation3 + $0x20] sm:$0xff]  ;;  %v66_v10 = vld [vmem:[#allocation3 + $0x28] sm:$0xff]  ;;  %v67_v15 = vld [vmem:[#allocation3 + $0x30] sm:$0xff]  ;;  %v207_v3 = vand.u32 127, %v206_v57  ;;  %s3139_s15 = smov 96   ;;  %vm1749_vm6 = vcmask 1041408  }
  0x2b   :  { %v59_v11 = vld [vmem:[%s3711_s1] sm:$0xf]  ;;  %v113_v13 = vld [vmem:[%s3710_s0 + $0x8] sm:$0xff]  ;;  %v3231_v14 = vpack.c.bf16 %v66_v10, %v65_v9  ;;  %v71_v21 = vld [vmem:[#allocation3 + $0x50] sm:$0xff]  ;;  %vm1760_vm7 = vcmask 1024  }
  0x2c   :  { %2497 = vmatpush3.bf16.msra.mxu1 %v3215_v6  ;;  %2210 = vmatprep.subr.msk.mxu0 %vm127_vm1, %v59_v11  ;;  %v112_v12 = vld [vmem:[%s3710_s0] sm:$0xff]  ;;  %v70_v19 = vld [vmem:[#allocation3 + $0x48] sm:$0xff]  ;;  %v75_v27 = vld [vmem:[#allocation3 + $0x70] sm:$0xff]  ;;  %vm208_vm3 = vcmp.ge.s32.totalorder %v207_v3, 32  ;;  %vm209_vm4 = vcmp.lt.s32.totalorder %v207_v3, 64 }
  0x2d   :  { %2498 = vmatprep.subr.bf16.mxu1 %v3134_v1  ;;  %2211 = vmatpush3.msk.msra.mxu0 %vm127_vm1, %v59_v11  ;;  %v68_v16 = vld [vmem:[#allocation3 + $0x38] sm:$0xff]  ;;  %v69_v18 = vld [vmem:[#allocation3 + $0x40] sm:$0xff]  ;;  %v74_v25 = vld [vmem:[#allocation3 + $0x68] sm:$0xff] }
  0x2e   :  { %2212 = vmatprep.mubr.msk.f32.mxu0 %vm120_vm2, %v112_v12  ;;  %v3236_v17 = vpack.c.bf16 %v68_v16, %v67_v15  ;;  %v3240_v20 = vpack.c.bf16 %v70_v19, %v69_v18  ;;  %v72_v22 = vld [vmem:[#allocation3 + $0x58] sm:$0xff]  ;;  %v73_v24 = vld [vmem:[#allocation3 + $0x60] sm:$0xff]  ;;  %v94_v31 = vld [vmem:[#allocation5 + $0x88] sm:$0xff] }
  0x2f   :  { %2213 = vmatmul.mubr.msk.f32.vlgmr.msra.gmra.mrb[0].mxu0 %vm120_vm2, %v113_v13  ;;  %v3244_v23 = vpack.c.bf16 %v72_v22, %v71_v21  ;;  %v3248_v26 = vpack.c.bf16 %v74_v25, %v73_v24  ;;  %v76_v28 = vld [vmem:[#allocation3 + $0x78] sm:$0xff]  ;;  %v93_v30 = vld [vmem:[#allocation5 + $0x80] sm:$0xff]  ;;  %v78_v34 = vld [vmem:[#allocation5 + $0x8] sm:$0xff] }
  0x30   :  { %2500 = vmatpush3.bf16.msra.mxu1 %v3218_v8  ;;  %371 = vmatprep.mubr.f32.mxu0 %v3136_v2  ;;  %v3252_v29 = vpack.c.bf16 %v76_v28, %v75_v27  ;;  %v77_v32 = vld [vmem:[#allocation5] sm:$0xff]  ;;  %v3276_v33 = vpack.c.bf16 %v94_v31, %v93_v30  ;;  %v95_v35 = vld [vmem:[#allocation5 + $0x90] sm:$0xff]  ;;  %v96_v36 = vld [vmem:[#allocation5 + $0x98] sm:$0xff] }
  0x31   :  { %2501 = vmatprep.subr.bf16.mxu1 %v3134_v1  ;;  %v3278_v37 = vpack.c.bf16 %v78_v34, %v77_v32  ;;  %v3280_v38 = vpack.c.bf16 %v96_v36, %v95_v35  ;;  %v79_v39 = vld [vmem:[#allocation5 + $0x10] sm:$0xff]  ;;  %v80_v40 = vld [vmem:[#allocation5 + $0x18] sm:$0xff]  ;;  %v97_v41 = vld [vmem:[#allocation5 + $0xa0] sm:$0xff] }
  0x32   :  { %2520 = vmatprep.subr.bf16.mxu0 %v3276_v33  ;;  %v98_v42 = vld [vmem:[#allocation5 + $0xa8] sm:$0xff]  ;;  %v3284_v43 = vpack.c.bf16 %v80_v40, %v79_v39  ;;  %v81_v45 = vld [vmem:[#allocation5 + $0x20] sm:$0xff]  ;;  %v1768_v48 = vld [vmem:[%s3712_s2] ss:$0 sm:$0xff]  ;;  %s3137_s2 = smov 64  }
  0x33   :  { %2522 = vmatpush3.bf16.msra.mxu0 %v3278_v37  ;;  %v3287_v44 = vpack.c.bf16 %v98_v42, %v97_v41  ;;  %v82_v46 = vld [vmem:[#allocation5 + $0x28] sm:$0xff]  ;;  %v99_v59 = vld [vmem:[#allocation5 + $0xb0] sm:$0xff]  ;;  %v100_v60 = vld [vmem:[#allocation5 + $0xb8] sm:$0xff] }
  0x34   :  { %2503 = vmatpush3.bf16.msra.mxu1 %v3231_v14  ;;  %2524 = vmatprep.subr.bf16.mxu0 %v3280_v38  ;;  %v3290_v47 = vpack.c.bf16 %v82_v46, %v81_v45  ;;  %v3302_v62 = vpack.c.bf16 %v100_v60, %v99_v59  ;;  %v83_v63 = vld [vmem:[#allocation5 + $0x30] sm:$0xff]  ;;  %v84_v0 = vld [vmem:[#allocation5 + $0x38] sm:$0xff]  ;;  %v101_v5 = vld [vmem:[#allocation5 + $0xc0] sm:$0xff] }
  0x35   :  { %2504 = vmatprep.subr.bf16.mxu1 %v3134_v1  ;;  %v3304_v4 = vpack.c.bf16 %v84_v0, %v83_v63  ;;  %v102_v7 = vld [vmem:[#allocation5 + $0xc8] sm:$0xff]  ;;  %v85_v10 = vld [vmem:[#allocation5 + $0x40] sm:$0xff]  ;;  %v103_v13 = vld [vmem:[#allocation5 + $0xd0] sm:$0xff] }
  0x36   :  { %v3308_v9 = vpack.c.bf16 %v102_v7, %v101_v5  ;;  %v86_v11 = vld [vmem:[#allocation5 + $0x48] sm:$0xff]  ;;  %v104_v15 = vld [vmem:[#allocation5 + $0xd8] sm:$0xff]  ;;  %vm3314_vm5 = vmand %vm208_vm3, %vm209_vm4 }
  0x37   :  { %2526 = vmatpush3.bf16.msra.mxu0 %v3284_v43  ;;  %v3310_v12 = vpack.c.bf16 %v86_v11, %v85_v10  ;;  %v3318_v18 = vpack.c.bf16 %v104_v15, %v103_v13  ;;  %v87_v19 = vld [vmem:[#allocation5 + $0x50] sm:$0xff]  ;;  %v88_v21 = vld [vmem:[#allocation5 + $0x58] sm:$0xff]  ;;  %v105_v24 = vld [vmem:[#allocation5 + $0xe0] sm:$0xff] }
  0x38   :  { %2506 = vmatpush3.bf16.msra.mxu1 %v3236_v17  ;;  %2528 = vmatprep.subr.bf16.mxu0 %v3287_v44  ;;  %v3320_v22 = vpack.c.bf16 %v88_v21, %v87_v19  ;;  %v106_v25 = vld [vmem:[#allocation5 + $0xe8] sm:$0xff]  ;;  %v89_v27 = vld [vmem:[#allocation5 + $0x60] sm:$0xff]  ;;  %v107_v31 = vld [vmem:[#allocation5 + $0xf0] sm:$0xff] }
  0x39   :  { %2507 = vmatprep.subr.bf16.mxu1 %v3134_v1  ;;  %v3323_v28 = vpack.c.bf16 %v106_v25, %v105_v24  ;;  %v90_v30 = vld [vmem:[#allocation5 + $0x68] sm:$0xff]  ;;  %v108_v32 = vld [vmem:[#allocation5 + $0xf8] sm:$0xff]  ;;  %v91_v40 = vld [vmem:[#allocation5 + $0x70] sm:$0xff] }
  0x3a   :  { %v3326_v35 = vpack.c.bf16 %v90_v30, %v89_v27  ;;  %v3329_v39 = vpack.c.bf16 %v108_v32, %v107_v31  ;;  %v92_v41 = vld [vmem:[#allocation5 + $0x78] sm:$0xff] }
  0x3b   :  { %2530 = vmatpush3.bf16.msra.mxu0 %v3290_v47  ;;  %v3336_v45 = vpack.c.bf16 %v92_v41, %v91_v40  ;;  %v3382_v60 = vld [vmem:[%s3715_s5] ss:$0 sm:$0xff] }
  0x3c   :  { %2509 = vmatpush3.bf16.msra.mxu1 %v3240_v20  ;;  %2532 = vmatprep.subr.bf16.mxu0 %v3302_v62 }
  0x3d   :  { %2510 = vmatprep.subr.bf16.mxu1 %v3134_v1 }
  0x3f   :  { %2534 = vmatpush3.bf16.msra.mxu0 %v3304_v4 }
  0x40   :  { %2512 = vmatpush3.bf16.msra.mxu1 %v3244_v23  ;;  %2536 = vmatprep.subr.bf16.mxu0 %v3308_v9 }
  0x41   :  { %2513 = vmatprep.subr.bf16.mxu1 %v3134_v1 }
  0x43   :  { %2538 = vmatpush3.bf16.msra.mxu0 %v3310_v12 }
  0x44   :  { %2515 = vmatpush3.bf16.msra.mxu1 %v3248_v26  ;;  %2540 = vmatprep.subr.bf16.mxu0 %v3318_v18 }
  0x45   :  { %2516 = vmatprep.subr.bf16.mxu1 %v3134_v1 }
  0x47   :  { %2542 = vmatpush3.bf16.msra.mxu0 %v3320_v22 }
  0x48   :  { %2518 = vmatpush3.bf16.msra.mxu1 %v3252_v29  ;;  %2544 = vmatprep.subr.bf16.mxu0 %v3323_v28 }
  0x49   :  { %2551 = vmatprep.subr.bf16.mxu1 %v3134_v1 }
  0x4b   :  { %2248 = vmatmul.mubr.f32.vlgmr.msra.gmra.mrb[0].mxu1 %v3136_v2  ;;  %2546 = vmatpush3.bf16.msra.mxu0 %v3326_v35 }
  0x4c   :  { %2553 = vmatpush3.bf16.msra.mxu1 %v3215_v6  ;;  %2282 = vmatprep.mubr.msk.f32.mxu1 %vm3135_vm0, %v3136_v2 }
  0x4d   :  { %2554 = vmatprep.subr.bf16.mxu1 %v3134_v1  ;;  %2548 = vmatprep.subr.bf16.mxu0 %v3329_v39 }
  0x4f   :  { %2550 = vmatpush3.bf16.msra.mxu0 %v3336_v45 }
  0x50   :  { %2556 = vmatpush3.bf16.msra.mxu1 %v3218_v8  ;;  %2576 = vmatprep.subr.bf16.mxu0 %v3276_v33 }
  0x51   :  { %2557 = vmatprep.subr.bf16.mxu1 %v3134_v1 }
  0x54   :  { %2559 = vmatpush3.bf16.msra.mxu1 %v3231_v14 }
  0x55   :  { %2560 = vmatprep.subr.bf16.mxu1 %v3134_v1 }
  0x58   :  { %2562 = vmatpush3.bf16.msra.mxu1 %v3236_v17 }
  0x59   :  { %2563 = vmatprep.subr.bf16.mxu1 %v3134_v1 }
  0x5c   :  { %2565 = vmatpush3.bf16.msra.mxu1 %v3240_v20 }
  0x5d   :  { %2566 = vmatprep.subr.bf16.mxu1 %v3134_v1 }
  0x60   :  { %2568 = vmatpush3.bf16.msra.mxu1 %v3244_v23 }
  0x61   :  { %2569 = vmatprep.subr.bf16.mxu1 %v3134_v1 }
  0x64   :  { %2571 = vmatpush3.bf16.msra.mxu1 %v3248_v26 }
  0x65   :  { %2572 = vmatprep.subr.bf16.mxu1 %v3134_v1 }
  0x68   :  { %2574 = vmatpush3.bf16.msra.mxu1 %v3252_v29 }
  0x69   :  { %2607 = vmatprep.subr.bf16.mxu1 %v3134_v1 }
 0x102   :  { %v2214_v49 = vpop.f32.mrb[0].mxu0 }
 0x103   :  { %v3297_v50 = vadd.f32 %v2214_v49, %v1768_v48  ;;  %v197_v51 = vpop.f32.mrb[1].mxu0 }
 0x104   :  { %v3299_v52 = vadd.f32 %v1768_v48, %v197_v51 }
 0x11e   :  { %v277_v53 = vpop.f32.mrb[0].mxu1 }
 0x11f   :  { %v281_v54 = vadd.f32 %v277_v53, %v3299_v52  ;;  %v2249_v55 = vpop.f32.mrb[1].mxu1 }
 0x121   :  { %v1772_v56 = vmul.f32 -1.442695, %v281_v54 }
 0x123   :  { %2953 = vpow2.f32 %v1772_v56 }
 0x124   :  { %2955 = vtanh.f32 %v281_v54 }
 0x12d   :  { %v2954_v58 = vpop.eup %2953 }
 0x12e   :  { %v286_v61 = vadd.f32 1.0, %v2954_v58  ;;  %v2956_v34 = vpop.eup %2955 }
 0x130   :  { %2957 = vrcp.f32 %v286_v61 }
 0x13a   :  { %v2958_v36 = vpop.eup %2957 }
 0x13b   :  { %v289_v42 = vsel %vm3314_vm5, %v2956_v34, %v2958_v36 }
 0x13c   :  { %292 = vrot.lane.b32.xlu1 %v289_v42, %s3137_s2  ;;  %290 = vrot.lane.b32.xlu0 %v289_v42, %s3138_s14  ;;  %v296_v49 = vmul.f32 0.0, %v289_v42 }
 0x140   :  { %294 = vrot.lane.b32.xlu0 %v289_v42, %s3139_s15 }
 0x1ae   :  { %v291_v46 = vpop.permute.xlu0 %290  ;;  %v293_v55 = vpop.permute.xlu1 %292 }
 0x1b2   :  { %v295_v48 = vpop.permute.xlu0 %294 }
 0x1b3   :  { %v297_v51 = vmul.f32 %v295_v48, %v291_v46 }
 0x1b5   :  { %v3342_v53 = vadd.f32 %v297_v51, %v296_v49 }
 0x1b7   :  { %2959 = vtanh.f32 %v3342_v53  ;;  %v488_v25 = vrot.slane %v3342_v53, 6 }
 0x1c1   :  { %v2960_v54 = vpop.eup %2959 }
 0x1c2   :  { %v300_v56 = vmul.f32 %v2960_v54, %v293_v55 }
 0x1c4   :  { %372 = vmatmul.mubr.f32.vlgmr.msra.gmra.mrb[2].mxu0 %v300_v56  ;;  %2283 = vmatmul.mubr.f32.vlgmr.msra.gmra.mrb[2].mxu1 %v300_v56 }
 0x1c5   :  { %2609 = vmatpush3.bf16.msra.mxu1 %v3215_v6  ;;  %2578 = vmatpush3.bf16.msra.mxu0 %v3278_v37 }
 0x1c6   :  { %2610 = vmatprep.subr.bf16.mxu1 %v3134_v1  ;;  %2580 = vmatprep.subr.bf16.mxu0 %v3280_v38 }
 0x1c7   :  { %2317 = vmatprep.mubr.msk.f32.mxu1 %vm3135_vm0, %v3136_v2 }
 0x1c9   :  { %2612 = vmatpush3.bf16.msra.mxu1 %v3218_v8  ;;  %2582 = vmatpush3.bf16.msra.mxu0 %v3284_v43 }
 0x1ca   :  { %2613 = vmatprep.subr.bf16.mxu1 %v3134_v1  ;;  %2584 = vmatprep.subr.bf16.mxu0 %v3287_v44 }
 0x1cd   :  { %2615 = vmatpush3.bf16.msra.mxu1 %v3231_v14  ;;  %2586 = vmatpush3.bf16.msra.mxu0 %v3290_v47 }
 0x1ce   :  { %2616 = vmatprep.subr.bf16.mxu1 %v3134_v1  ;;  %2588 = vmatprep.subr.bf16.mxu0 %v3302_v62 }
 0x1d1   :  { %2618 = vmatpush3.bf16.msra.mxu1 %v3236_v17  ;;  %2590 = vmatpush3.bf16.msra.mxu0 %v3304_v4 }
 0x1d2   :  { %2619 = vmatprep.subr.bf16.mxu1 %v3134_v1  ;;  %2592 = vmatprep.subr.bf16.mxu0 %v3308_v9 }
 0x1d5   :  { %2621 = vmatpush3.bf16.msra.mxu1 %v3240_v20  ;;  %2594 = vmatpush3.bf16.msra.mxu0 %v3310_v12 }
 0x1d6   :  { %2622 = vmatprep.subr.bf16.mxu1 %v3134_v1  ;;  %2596 = vmatprep.subr.bf16.mxu0 %v3318_v18 }
 0x1d9   :  { %2624 = vmatpush3.bf16.msra.mxu1 %v3244_v23  ;;  %2598 = vmatpush3.bf16.msra.mxu0 %v3320_v22 }
 0x1da   :  { %2625 = vmatprep.subr.bf16.mxu1 %v3134_v1  ;;  %2600 = vmatprep.subr.bf16.mxu0 %v3323_v28 }
 0x1dd   :  { %2627 = vmatpush3.bf16.msra.mxu1 %v3248_v26  ;;  %2602 = vmatpush3.bf16.msra.mxu0 %v3326_v35 }
 0x1de   :  { %2628 = vmatprep.subr.bf16.mxu1 %v3134_v1  ;;  %2604 = vmatprep.subr.bf16.mxu0 %v3329_v39 }
 0x1e1   :  { %2630 = vmatpush3.bf16.msra.mxu1 %v3252_v29  ;;  %2606 = vmatpush3.bf16.msra.mxu0 %v3336_v45 }
 0x1e2   :  { %2663 = vmatprep.subr.bf16.mxu1 %v3134_v1  ;;  %2632 = vmatprep.subr.bf16.mxu0 %v3276_v33 }
 0x297   :  { %v1843_v57 = vpop.f32.mrb[2].mxu0  ;;  %v462_v58 = vpop.f32.mrb[2].mxu1 }
 0x298   :  { %v467_v59 = vrot.slane %v462_v58, 6  ;;  %v1844_v61 = vpop.f32.mrb[3].mxu0  ;;  %v2284_v63 = vpop.f32.mrb[3].mxu1 }
 0x299   :  { %v1845_v0 = vadd.f32 %v1844_v61, %v1843_v57 }
 0x29a   :  { %v469_v3 = vadd.f32 %v467_v59, %v3299_v52 }
 0x29b   :  { %v374_v5 = vadd.f32 %v1845_v0, %v3382_v60 }
 0x29c   :  { %v1775_v7 = vmul.f32 -1.442695, %v469_v3 }
 0x29d   :  { %v1774_v10 = vmul.f32 -1.442695, %v374_v5 }
 0x29e   :  { %2961 = vpow2.f32 %v1775_v7 }
 0x29f   :  { %2963 = vpow2.f32 %v1774_v10 }
 0x2a0   :  { %2965 = vtanh.f32 %v469_v3 }
 0x2a8   :  { %v2962_v11 = vpop.eup %2961 }
 0x2a9   :  { %v2964_v13 = vpop.eup %2963  ;;  %v474_v15 = vadd.f32 1.0, %v2962_v11 }
 0x2aa   :  { %v381_v19 = vadd.f32 1.0, %v2964_v13  ;;  %v2966_v21 = vpop.eup %2965 }
 0x2ab   :  { %2967 = vrcp.f32 %v474_v15 }
 0x2ac   :  { %2969 = vrcp.f32 %v381_v19 }
 0x2ad   :  { %2971 = vtanh.f32 %v374_v5 }
 0x2b5   :  { %v2968_v24 = vpop.eup %2967 }
 0x2b6   :  { %v477_v27 = vsel %vm3314_vm5, %v2966_v21, %v2968_v24  ;;  %v2970_v32 = vpop.eup %2969 }
 0x2b7   :  { %v479_v30 = vrot.slane %v477_v27, 2  ;;  %v490_v31 = vmul.f32 %v488_v25, %v477_v27  ;;  %v2972_v34 = vpop.eup %2971 }
 0x2b8   :  { %v384_v36 = vsel %vm3314_vm5, %v2972_v34, %v2970_v32 }
 0x2b9   :  { %485 = vrot.lane.b32.xlu0 %v479_v30, %s3139_s15  ;;  %481 = vrot.lane.b32.xlu1 %v479_v30, %s3138_s14  ;;  %v391_v53 = vmul.f32 0.0, %v384_v36 }
 0x2bd   :  { %389 = vrot.lane.b32.xlu0 %v384_v36, %s3139_s15  ;;  %385 = vrot.lane.b32.xlu1 %v384_v36, %s3138_s14 }
 0x2c1   :  { %387 = vrot.lane.b32.xlu0 %v384_v36, %s3137_s2  ;;  %483 = vrot.lane.b32.xlu1 %v479_v30, %s3137_s2 }
 0x32b   :  { %v486_v40 = vpop.permute.xlu0 %485  ;;  %v482_v41 = vpop.permute.xlu1 %481 }
 0x32c   :  { %v491_v42 = vmul.f32 %v486_v40, %v482_v41 }
 0x32e   :  { %v493_v46 = vrot.slane %v491_v42, 6 }
 0x32f   :  { %v390_v48 = vpop.permute.xlu0 %389  ;;  %v386_v49 = vpop.permute.xlu1 %385 }
 0x330   :  { %v3397_v51 = vadd.f32 %v493_v46, %v490_v31  ;;  %v392_v54 = vmul.f32 %v390_v48, %v386_v49 }
 0x332   :  { %2973 = vtanh.f32 %v3397_v51  ;;  %v3400_v55 = vadd.f32 %v392_v54, %v391_v53  ;;  %v682_v36 = vrot.slane %v3397_v51, 6 }
 0x333   :  { %v388_v59 = vpop.permute.xlu0 %387  ;;  %v484_v61 = vpop.permute.xlu1 %483 }
 0x334   :  { %2975 = vtanh.f32 %v3400_v55 }
 0x33c   :  { %v2974_v56 = vpop.eup %2973 }
 0x33d   :  { %v498_v57 = vrot.slane %v2974_v56, 2 }
 0x33e   :  { %v2976_v58 = vpop.eup %2975 }
 0x33f   :  { %v395_v63 = vmul.f32 %v2976_v58, %v388_v59  ;;  %v500_v0 = vmul.f32 %v498_v57, %v484_v61 }
 0x341   :  { %565 = vmatprep.mubr.f32.mxu0 %v395_v63  ;;  %2318 = vmatmul.mubr.f32.vlgmr.msra.gmra.mrb[4].mxu1 %v500_v0 }
 0x342   :  { %566 = vmatmul.mubr.f32.vlgmr.msra.gmra.mrb[4].mxu0 %v500_v0  ;;  %2665 = vmatpush3.bf16.msra.mxu1 %v3215_v6 }
 0x343   :  { %2634 = vmatpush3.bf16.msra.mxu0 %v3278_v37  ;;  %2666 = vmatprep.subr.bf16.mxu1 %v3134_v1 }
 0x344   :  { %2636 = vmatprep.subr.bf16.mxu0 %v3280_v38  ;;  %2352 = vmatprep.mubr.msk.f32.mxu1 %vm3135_vm0, %v3136_v2 }
 0x346   :  { %2668 = vmatpush3.bf16.msra.mxu1 %v3218_v8 }
 0x347   :  { %2638 = vmatpush3.bf16.msra.mxu0 %v3284_v43  ;;  %2669 = vmatprep.subr.bf16.mxu1 %v3134_v1 }
 0x348   :  { %2640 = vmatprep.subr.bf16.mxu0 %v3287_v44 }
 0x34a   :  { %2671 = vmatpush3.bf16.msra.mxu1 %v3231_v14 }
 0x34b   :  { %2642 = vmatpush3.bf16.msra.mxu0 %v3290_v47  ;;  %2672 = vmatprep.subr.bf16.mxu1 %v3134_v1 }
 0x34c   :  { %2644 = vmatprep.subr.bf16.mxu0 %v3302_v62 }
 0x34e   :  { %2674 = vmatpush3.bf16.msra.mxu1 %v3236_v17 }
 0x34f   :  { %2646 = vmatpush3.bf16.msra.mxu0 %v3304_v4  ;;  %2675 = vmatprep.subr.bf16.mxu1 %v3134_v1 }
 0x350   :  { %2648 = vmatprep.subr.bf16.mxu0 %v3308_v9 }
 0x352   :  { %2677 = vmatpush3.bf16.msra.mxu1 %v3240_v20 }
 0x353   :  { %2650 = vmatpush3.bf16.msra.mxu0 %v3310_v12  ;;  %2678 = vmatprep.subr.bf16.mxu1 %v3134_v1 }
 0x354   :  { %2652 = vmatprep.subr.bf16.mxu0 %v3318_v18 }
 0x356   :  { %2680 = vmatpush3.bf16.msra.mxu1 %v3244_v23 }
 0x357   :  { %2654 = vmatpush3.bf16.msra.mxu0 %v3320_v22  ;;  %2681 = vmatprep.subr.bf16.mxu1 %v3134_v1 }
 0x358   :  { %2656 = vmatprep.subr.bf16.mxu0 %v3323_v28 }
 0x35a   :  { %2683 = vmatpush3.bf16.msra.mxu1 %v3248_v26 }
 0x35b   :  { %2658 = vmatpush3.bf16.msra.mxu0 %v3326_v35  ;;  %2684 = vmatprep.subr.bf16.mxu1 %v3134_v1 }
 0x35c   :  { %2660 = vmatprep.subr.bf16.mxu0 %v3329_v39 }
 0x35e   :  { %2686 = vmatpush3.bf16.msra.mxu1 %v3252_v29 }
 0x35f   :  { %2662 = vmatpush3.bf16.msra.mxu0 %v3336_v45  ;;  %2719 = vmatprep.subr.bf16.mxu1 %v3134_v1 }
 0x360   :  { %2688 = vmatprep.subr.bf16.mxu0 %v3276_v33 }
 0x414   :  { %v656_v3 = vpop.f32.mrb[4].mxu1 }
 0x415   :  { %v661_v5 = vrot.slane %v656_v3, 4  ;;  %v1895_v7 = vpop.f32.mrb[4].mxu0  ;;  %v2319_v10 = vpop.f32.mrb[5].mxu1 }
 0x416   :  { %v1896_v11 = vpop.f32.mrb[5].mxu0 }
 0x417   :  { %v663_v13 = vadd.f32 %v661_v5, %v3299_v52  ;;  %v1897_v15 = vadd.f32 %v1896_v11, %v1895_v7 }
 0x419   :  { %v1777_v19 = vmul.f32 -1.442695, %v663_v13  ;;  %v568_v21 = vadd.f32 %v1897_v15, %v3382_v60 }
 0x41b   :  { %2977 = vpow2.f32 %v1777_v19  ;;  %v1776_v24 = vmul.f32 -1.442695, %v568_v21 }
 0x41d   :  { %2979 = vpow2.f32 %v1776_v24 }
 0x41e   :  { %2981 = vtanh.f32 %v663_v13 }
 0x425   :  { %v2978_v25 = vpop.eup %2977 }
 0x426   :  { %v668_v27 = vadd.f32 1.0, %v2978_v25 }
 0x427   :  { %v2980_v30 = vpop.eup %2979 }
 0x428   :  { %2983 = vrcp.f32 %v668_v27  ;;  %v575_v31 = vadd.f32 1.0, %v2980_v30  ;;  %v2982_v32 = vpop.eup %2981 }
 0x42a   :  { %2985 = vrcp.f32 %v575_v31 }
 0x42b   :  { %2987 = vtanh.f32 %v568_v21 }
 0x432   :  { %v2984_v34 = vpop.eup %2983 }
 0x433   :  { %v671_v40 = vsel %vm3314_vm5, %v2982_v32, %v2984_v34 }
 0x434   :  { %v673_v41 = vrot.slane %v671_v40, 4  ;;  %v684_v42 = vmul.f32 %v682_v36, %v671_v40  ;;  %v2986_v46 = vpop.eup %2985 }
 0x435   :  { %v2988_v48 = vpop.eup %2987 }
 0x436   :  { %679 = vrot.lane.b32.xlu0 %v673_v41, %s3139_s15  ;;  %675 = vrot.lane.b32.xlu1 %v673_v41, %s3138_s14  ;;  %v578_v49 = vsel %vm3314_vm5, %v2988_v48, %v2986_v46 }
 0x437   :  { %v585_v61 = vmul.f32 %v578_v49, %v3400_v55 }
 0x43a   :  { %583 = vrot.lane.b32.xlu0 %v578_v49, %s3139_s15  ;;  %579 = vrot.lane.b32.xlu1 %v578_v49, %s3138_s14 }
 0x43e   :  { %581 = vrot.lane.b32.xlu0 %v578_v49, %s3137_s2  ;;  %677 = vrot.lane.b32.xlu1 %v673_v41, %s3137_s2 }
 0x4a8   :  { %v680_v51 = vpop.permute.xlu0 %679  ;;  %v676_v53 = vpop.permute.xlu1 %675 }
 0x4a9   :  { %v685_v54 = vmul.f32 %v680_v51, %v676_v53 }
 0x4ab   :  { %v687_v56 = vrot.slane %v685_v54, 4 }
 0x4ac   :  { %v584_v57 = vpop.permute.xlu0 %583  ;;  %v580_v58 = vpop.permute.xlu1 %579 }
 0x4ad   :  { %v3450_v59 = vadd.f32 %v687_v56, %v684_v42  ;;  %v586_v63 = vmul.f32 %v584_v57, %v580_v58 }
 0x4af   :  { %2989 = vtanh.f32 %v3450_v59  ;;  %v3454_v0 = vadd.f32 %v586_v63, %v585_v61  ;;  %v876_v49 = vrot.slane %v3450_v59, 6 }
 0x4b0   :  { %v582_v10 = vpop.permute.xlu0 %581  ;;  %v678_v11 = vpop.permute.xlu1 %677 }
 0x4b1   :  { %2991 = vtanh.f32 %v3454_v0 }
 0x4b9   :  { %v2990_v3 = vpop.eup %2989 }
 0x4ba   :  { %v692_v5 = vrot.slane %v2990_v3, 4 }
 0x4bb   :  { %v2992_v7 = vpop.eup %2991 }
 0x4bc   :  { %v589_v13 = vmul.f32 %v2992_v7, %v582_v10  ;;  %v694_v15 = vmul.f32 %v692_v5, %v678_v11 }
 0x4be   :  { %759 = vmatprep.mubr.f32.mxu0 %v589_v13  ;;  %2353 = vmatmul.mubr.f32.vlgmr.msra.gmra.mrb[6].mxu1 %v694_v15 }
 0x4bf   :  { %760 = vmatmul.mubr.f32.vlgmr.msra.gmra.mrb[6].mxu0 %v694_v15  ;;  %2721 = vmatpush3.bf16.msra.mxu1 %v3215_v6 }
 0x4c0   :  { %2690 = vmatpush3.bf16.msra.mxu0 %v3278_v37  ;;  %2722 = vmatprep.subr.bf16.mxu1 %v3134_v1 }
 0x4c1   :  { %2692 = vmatprep.subr.bf16.mxu0 %v3280_v38  ;;  %2387 = vmatprep.mubr.msk.f32.mxu1 %vm3135_vm0, %v3136_v2 }
 0x4c3   :  { %2724 = vmatpush3.bf16.msra.mxu1 %v3218_v8 }
 0x4c4   :  { %2694 = vmatpush3.bf16.msra.mxu0 %v3284_v43  ;;  %2725 = vmatprep.subr.bf16.mxu1 %v3134_v1 }
 0x4c5   :  { %2696 = vmatprep.subr.bf16.mxu0 %v3287_v44 }
 0x4c7   :  { %2727 = vmatpush3.bf16.msra.mxu1 %v3231_v14 }
 0x4c8   :  { %2698 = vmatpush3.bf16.msra.mxu0 %v3290_v47  ;;  %2728 = vmatprep.subr.bf16.mxu1 %v3134_v1 }
 0x4c9   :  { %2700 = vmatprep.subr.bf16.mxu0 %v3302_v62 }
 0x4cb   :  { %2730 = vmatpush3.bf16.msra.mxu1 %v3236_v17 }
 0x4cc   :  { %2702 = vmatpush3.bf16.msra.mxu0 %v3304_v4  ;;  %2731 = vmatprep.subr.bf16.mxu1 %v3134_v1 }
 0x4cd   :  { %2704 = vmatprep.subr.bf16.mxu0 %v3308_v9 }
 0x4cf   :  { %2733 = vmatpush3.bf16.msra.mxu1 %v3240_v20 }
 0x4d0   :  { %2706 = vmatpush3.bf16.msra.mxu0 %v3310_v12  ;;  %2734 = vmatprep.subr.bf16.mxu1 %v3134_v1 }
 0x4d1   :  { %2708 = vmatprep.subr.bf16.mxu0 %v3318_v18 }
 0x4d3   :  { %2736 = vmatpush3.bf16.msra.mxu1 %v3244_v23 }
 0x4d4   :  { %2710 = vmatpush3.bf16.msra.mxu0 %v3320_v22  ;;  %2737 = vmatprep.subr.bf16.mxu1 %v3134_v1 }
 0x4d5   :  { %2712 = vmatprep.subr.bf16.mxu0 %v3323_v28 }
 0x4d7   :  { %2739 = vmatpush3.bf16.msra.mxu1 %v3248_v26 }
 0x4d8   :  { %2714 = vmatpush3.bf16.msra.mxu0 %v3326_v35  ;;  %2740 = vmatprep.subr.bf16.mxu1 %v3134_v1 }
 0x4d9   :  { %2716 = vmatprep.subr.bf16.mxu0 %v3329_v39 }
 0x4db   :  { %2742 = vmatpush3.bf16.msra.mxu1 %v3252_v29 }
 0x4dc   :  { %2718 = vmatpush3.bf16.msra.mxu0 %v3336_v45  ;;  %2775 = vmatprep.subr.bf16.mxu1 %v3134_v1 }
 0x4dd   :  { %2744 = vmatprep.subr.bf16.mxu0 %v3276_v33 }
 0x591   :  { %v850_v55 = vpop.f32.mrb[6].mxu1 }
 0x592   :  { %v855_v19 = vrot.slane %v850_v55, 2  ;;  %v1947_v21 = vpop.f32.mrb[6].mxu0  ;;  %v2354_v24 = vpop.f32.mrb[7].mxu1 }
 0x593   :  { %v1948_v25 = vpop.f32.mrb[7].mxu0 }
 0x594   :  { %v857_v27 = vadd.f32 %v855_v19, %v3299_v52  ;;  %v1949_v30 = vadd.f32 %v1948_v25, %v1947_v21 }
 0x596   :  { %v1779_v31 = vmul.f32 -1.442695, %v857_v27  ;;  %v762_v32 = vadd.f32 %v1949_v30, %v3382_v60 }
 0x598   :  { %2993 = vpow2.f32 %v1779_v31  ;;  %v1778_v34 = vmul.f32 -1.442695, %v762_v32 }
 0x59a   :  { %2995 = vpow2.f32 %v1778_v34 }
 0x59b   :  { %2997 = vtanh.f32 %v857_v27 }
 0x5a2   :  { %v2994_v36 = vpop.eup %2993 }
 0x5a3   :  { %v862_v40 = vadd.f32 1.0, %v2994_v36 }
 0x5a4   :  { %v2996_v41 = vpop.eup %2995 }
 0x5a5   :  { %2999 = vrcp.f32 %v862_v40  ;;  %v769_v42 = vadd.f32 1.0, %v2996_v41  ;;  %v2998_v46 = vpop.eup %2997 }
 0x5a7   :  { %3001 = vrcp.f32 %v769_v42 }
 0x5a8   :  { %3003 = vtanh.f32 %v762_v32 }
 0x5af   :  { %v3000_v48 = vpop.eup %2999 }
 0x5b0   :  { %v865_v52 = vsel %vm3314_vm5, %v2998_v46, %v3000_v48 }
 0x5b1   :  { %v867_v51 = vrot.slane %v865_v52, 6  ;;  %v878_v53 = vmul.f32 %v876_v49, %v865_v52  ;;  %v3002_v54 = vpop.eup %3001 }
 0x5b2   :  { %v3004_v56 = vpop.eup %3003 }
 0x5b3   :  { %873 = vrot.lane.b32.xlu0 %v867_v51, %s3139_s15  ;;  %869 = vrot.lane.b32.xlu1 %v867_v51, %s3138_s14  ;;  %v772_v57 = vsel %vm3314_vm5, %v3004_v56, %v3002_v54 }
 0x5b4   :  { %v779_v10 = vmul.f32 %v772_v57, %v3454_v0 }
 0x5b7   :  { %777 = vrot.lane.b32.xlu0 %v772_v57, %s3139_s15  ;;  %773 = vrot.lane.b32.xlu1 %v772_v57, %s3138_s14 }
 0x5bb   :  { %775 = vrot.lane.b32.xlu0 %v772_v57, %s3137_s2  ;;  %871 = vrot.lane.b32.xlu1 %v867_v51, %s3137_s2 }
 0x625   :  { %v874_v58 = vpop.permute.xlu0 %873  ;;  %v870_v59 = vpop.permute.xlu1 %869 }
 0x626   :  { %v879_v61 = vmul.f32 %v874_v58, %v870_v59 }
 0x628   :  { %v881_v63 = vrot.slane %v879_v61, 2 }
 0x629   :  { %v778_v3 = vpop.permute.xlu0 %777  ;;  %v774_v5 = vpop.permute.xlu1 %773 }
 0x62a   :  { %v3504_v7 = vadd.f32 %v881_v63, %v878_v53  ;;  %v780_v11 = vmul.f32 %v778_v3, %v774_v5 }
 0x62c   :  { %3005 = vtanh.f32 %v3504_v7  ;;  %v3508_v13 = vadd.f32 %v780_v11, %v779_v10  ;;  %v1064_v54 = vrot.slane %v3504_v7, 6 }
 0x62d   :  { %v776_v21 = vpop.permute.xlu0 %775  ;;  %v872_v24 = vpop.permute.xlu1 %871 }
 0x62e   :  { %3007 = vtanh.f32 %v3508_v13 }
 0x636   :  { %v3006_v15 = vpop.eup %3005 }
 0x637   :  { %v886_v55 = vrot.slane %v3006_v15, 6 }
 0x638   :  { %v3008_v19 = vpop.eup %3007 }
 0x639   :  { %v783_v25 = vmul.f32 %v3008_v19, %v776_v21  ;;  %v888_v27 = vmul.f32 %v886_v55, %v872_v24 }
 0x63b   :  { %953 = vmatprep.mubr.f32.mxu0 %v783_v25  ;;  %2388 = vmatmul.mubr.f32.vlgmr.msra.gmra.mrb[8].mxu1 %v888_v27 }
 0x63c   :  { %954 = vmatmul.mubr.f32.vlgmr.msra.gmra.mrb[8].mxu0 %v888_v27  ;;  %2777 = vmatpush3.bf16.msra.mxu1 %v3215_v6 }
 0x63d   :  { %2778 = vmatprep.subr.bf16.mxu1 %v3134_v1  ;;  %2746 = vmatpush3.bf16.msra.mxu0 %v3278_v37 }
 0x63e   :  { %2748 = vmatprep.subr.bf16.mxu0 %v3280_v38  ;;  %2422 = vmatprep.mubr.msk.f32.mxu1 %vm3135_vm0, %v3136_v2 }
 0x640   :  { %2780 = vmatpush3.bf16.msra.mxu1 %v3218_v8 }
 0x641   :  { %2781 = vmatprep.subr.bf16.mxu1 %v3134_v1  ;;  %2750 = vmatpush3.bf16.msra.mxu0 %v3284_v43 }
 0x642   :  { %2752 = vmatprep.subr.bf16.mxu0 %v3287_v44 }
 0x644   :  { %2783 = vmatpush3.bf16.msra.mxu1 %v3231_v14 }
 0x645   :  { %2784 = vmatprep.subr.bf16.mxu1 %v3134_v1  ;;  %2754 = vmatpush3.bf16.msra.mxu0 %v3290_v47 }
 0x646   :  { %2756 = vmatprep.subr.bf16.mxu0 %v3302_v62 }
 0x648   :  { %2786 = vmatpush3.bf16.msra.mxu1 %v3236_v17 }
 0x649   :  { %2787 = vmatprep.subr.bf16.mxu1 %v3134_v1  ;;  %2758 = vmatpush3.bf16.msra.mxu0 %v3304_v4 }
 0x64a   :  { %2760 = vmatprep.subr.bf16.mxu0 %v3308_v9 }
 0x64c   :  { %2789 = vmatpush3.bf16.msra.mxu1 %v3240_v20 }
 0x64d   :  { %2790 = vmatprep.subr.bf16.mxu1 %v3134_v1  ;;  %2762 = vmatpush3.bf16.msra.mxu0 %v3310_v12 }
 0x64e   :  { %2764 = vmatprep.subr.bf16.mxu0 %v3318_v18 }
 0x650   :  { %2792 = vmatpush3.bf16.msra.mxu1 %v3244_v23 }
 0x651   :  { %2793 = vmatprep.subr.bf16.mxu1 %v3134_v1  ;;  %2766 = vmatpush3.bf16.msra.mxu0 %v3320_v22 }
 0x652   :  { %2768 = vmatprep.subr.bf16.mxu0 %v3323_v28 }
 0x654   :  { %2795 = vmatpush3.bf16.msra.mxu1 %v3248_v26 }
 0x655   :  { %2796 = vmatprep.subr.bf16.mxu1 %v3134_v1  ;;  %2770 = vmatpush3.bf16.msra.mxu0 %v3326_v35 }
 0x656   :  { %2772 = vmatprep.subr.bf16.mxu0 %v3329_v39 }
 0x658   :  { %2798 = vmatpush3.bf16.msra.mxu1 %v3252_v29 }
 0x659   :  { %2774 = vmatpush3.bf16.msra.mxu0 %v3336_v45  ;;  %2831 = vmatprep.subr.bf16.mxu1 %v3134_v1 }
 0x65a   :  { %2800 = vmatprep.subr.bf16.mxu0 %v3276_v33 }
 0x70e   :  { %v1044_v0 = vpop.f32.mrb[8].mxu1 }
 0x70f   :  { %v1048_v30 = vadd.f32 %v1044_v0, %v3297_v50  ;;  %v1999_v31 = vpop.f32.mrb[8].mxu0  ;;  %v2389_v32 = vpop.f32.mrb[9].mxu1 }
 0x710   :  { %v2000_v34 = vpop.f32.mrb[9].mxu0 }
 0x711   :  { %v1781_v36 = vmul.f32 -1.442695, %v1048_v30  ;;  %v2001_v40 = vadd.f32 %v2000_v34, %v1999_v31 }
 0x713   :  { %3009 = vpow2.f32 %v1781_v36  ;;  %v956_v41 = vadd.f32 %v2001_v40, %v3382_v60 }
 0x715   :  { %v1780_v42 = vmul.f32 -1.442695, %v956_v41 }
 0x717   :  { %3011 = vpow2.f32 %v1780_v42 }
 0x718   :  { %3013 = vtanh.f32 %v1048_v30 }
 0x71d   :  { %v3010_v46 = vpop.eup %3009 }
 0x71e   :  { %v1053_v48 = vadd.f32 1.0, %v3010_v46 }
 0x720   :  { %3015 = vrcp.f32 %v1053_v48 }
 0x721   :  { %v3012_v49 = vpop.eup %3011  ;;  %3017 = vtanh.f32 %v956_v41 }
 0x722   :  { %v963_v52 = vadd.f32 1.0, %v3012_v49  ;;  %v3014_v51 = vpop.eup %3013 }
 0x724   :  { %3019 = vrcp.f32 %v963_v52 }
 0x72a   :  { %v3016_v53 = vpop.eup %3015 }
 0x72b   :  { %v1056_v56 = vsel %vm3314_vm5, %v3014_v51, %v3016_v53  ;;  %v3018_v58 = vpop.eup %3017 }
 0x72c   :  { %1061 = vrot.lane.b32.xlu0 %v1056_v56, %s3139_s15  ;;  %1057 = vrot.lane.b32.xlu1 %v1056_v56, %s3138_s14  ;;  %v1066_v57 = vmul.f32 %v1064_v54, %v1056_v56 }
 0x72e   :  { %v3020_v59 = vpop.eup %3019 }
 0x72f   :  { %v966_v61 = vsel %vm3314_vm5, %v3018_v58, %v3020_v59 }
 0x730   :  { %971 = vrot.lane.b32.xlu0 %v966_v61, %s3139_s15  ;;  %967 = vrot.lane.b32.xlu1 %v966_v61, %s3138_s14  ;;  %v973_v15 = vmul.f32 %v966_v61, %v3508_v13 }
 0x734   :  { %969 = vrot.lane.b32.xlu0 %v966_v61, %s3137_s2  ;;  %1059 = vrot.lane.b32.xlu1 %v1056_v56, %s3137_s2 }
 0x79e   :  { %v1062_v63 = vpop.permute.xlu0 %1061  ;;  %v1058_v3 = vpop.permute.xlu1 %1057 }
 0x79f   :  { %v1067_v5 = vmul.f32 %v1062_v63, %v1058_v3 }
 0x7a1   :  { %v3558_v7 = vadd.f32 %v1067_v5, %v1066_v57 }
 0x7a2   :  { %v972_v10 = vpop.permute.xlu0 %971  ;;  %v968_v11 = vpop.permute.xlu1 %967 }
 0x7a3   :  { %3021 = vtanh.f32 %v3558_v7  ;;  %v974_v55 = vmul.f32 %v972_v10, %v968_v11  ;;  %v1252_v57 = vrot.slane %v3558_v7, 6 }
 0x7a5   :  { %v3562_v19 = vadd.f32 %v974_v55, %v973_v15 }
 0x7a6   :  { %v1060_v24 = vpop.permute.xlu1 %1059  ;;  %v970_v0 = vpop.permute.xlu0 %969 }
 0x7a7   :  { %3023 = vtanh.f32 %v3562_v19 }
 0x7ad   :  { %v3022_v21 = vpop.eup %3021 }
 0x7ae   :  { %v1070_v25 = vmul.f32 %v3022_v21, %v1060_v24 }
 0x7b0   :  { %2423 = vmatmul.mubr.f32.vlgmr.msra.gmra.mrb[10].mxu1 %v1070_v25 }
 0x7b1   :  { %v3024_v27 = vpop.eup %3023  ;;  %2833 = vmatpush3.bf16.msra.mxu1 %v3215_v6  ;;  %2457 = vmatprep.mubr.msk.f32.mxu1 %vm3135_vm0, %v3136_v2 }
 0x7b2   :  { %v977_v30 = vmul.f32 %v3024_v27, %v970_v0  ;;  %2834 = vmatprep.subr.bf16.mxu1 %v3134_v1 }
 0x7b4   :  { %1135 = vmatprep.mubr.f32.mxu0 %v977_v30 }
 0x7b5   :  { %1136 = vmatmul.mubr.f32.vlgmr.msra.gmra.mrb[10].mxu0 %v1070_v25  ;;  %2836 = vmatpush3.bf16.msra.mxu1 %v3218_v8 }
 0x7b6   :  { %2802 = vmatpush3.bf16.msra.mxu0 %v3278_v37  ;;  %2837 = vmatprep.subr.bf16.mxu1 %v3134_v1 }
 0x7b7   :  { %2804 = vmatprep.subr.bf16.mxu0 %v3280_v38 }
 0x7b9   :  { %2839 = vmatpush3.bf16.msra.mxu1 %v3231_v14 }
 0x7ba   :  { %2806 = vmatpush3.bf16.msra.mxu0 %v3284_v43  ;;  %2840 = vmatprep.subr.bf16.mxu1 %v3134_v1 }
 0x7bb   :  { %2808 = vmatprep.subr.bf16.mxu0 %v3287_v44 }
 0x7bd   :  { %2842 = vmatpush3.bf16.msra.mxu1 %v3236_v17 }
 0x7be   :  { %2810 = vmatpush3.bf16.msra.mxu0 %v3290_v47  ;;  %2843 = vmatprep.subr.bf16.mxu1 %v3134_v1 }
 0x7bf   :  { %2812 = vmatprep.subr.bf16.mxu0 %v3302_v62 }
 0x7c1   :  { %2845 = vmatpush3.bf16.msra.mxu1 %v3240_v20 }
 0x7c2   :  { %2814 = vmatpush3.bf16.msra.mxu0 %v3304_v4  ;;  %2846 = vmatprep.subr.bf16.mxu1 %v3134_v1 }
 0x7c3   :  { %2816 = vmatprep.subr.bf16.mxu0 %v3308_v9 }
 0x7c5   :  { %2848 = vmatpush3.bf16.msra.mxu1 %v3244_v23 }
 0x7c6   :  { %2818 = vmatpush3.bf16.msra.mxu0 %v3310_v12  ;;  %2849 = vmatprep.subr.bf16.mxu1 %v3134_v1 }
 0x7c7   :  { %2820 = vmatprep.subr.bf16.mxu0 %v3318_v18 }
 0x7c9   :  { %2851 = vmatpush3.bf16.msra.mxu1 %v3248_v26 }
 0x7ca   :  { %2822 = vmatpush3.bf16.msra.mxu0 %v3320_v22  ;;  %2852 = vmatprep.subr.bf16.mxu1 %v3134_v1 }
 0x7cb   :  { %2824 = vmatprep.subr.bf16.mxu0 %v3323_v28 }
 0x7cd   :  { %2854 = vmatpush3.bf16.msra.mxu1 %v3252_v29 }
 0x7ce   :  { %2826 = vmatpush3.bf16.msra.mxu0 %v3326_v35  ;;  %2887 = vmatprep.subr.bf16.mxu1 %v3134_v1 }
 0x7cf   :  { %2828 = vmatprep.subr.bf16.mxu0 %v3329_v39 }
 0x7d2   :  { %2830 = vmatpush3.bf16.msra.mxu0 %v3336_v45 }
 0x7d3   :  { %2856 = vmatprep.subr.bf16.mxu0 %v3276_v33 }
 0x883   :  { %v1226_v13 = vpop.f32.mrb[10].mxu1 }
 0x884   :  { %v1231_v31 = vrot.slane %v1226_v13, 6  ;;  %v2424_v32 = vpop.f32.mrb[11].mxu1 }
 0x886   :  { %v1233_v34 = vadd.f32 %v1231_v31, %v3297_v50 }
 0x888   :  { %v1783_v36 = vmul.f32 -1.442695, %v1233_v34  ;;  %v2051_v40 = vpop.f32.mrb[10].mxu0 }
 0x889   :  { %v2052_v41 = vpop.f32.mrb[11].mxu0 }
 0x88a   :  { %3025 = vpow2.f32 %v1783_v36  ;;  %v2053_v42 = vadd.f32 %v2052_v41, %v2051_v40 }
 0x88c   :  { %v1138_v46 = vadd.f32 %v2053_v42, %v3382_v60 }
 0x88e   :  { %v1782_v48 = vmul.f32 -1.442695, %v1138_v46 }
 0x890   :  { %3027 = vpow2.f32 %v1782_v48 }
 0x891   :  { %3029 = vtanh.f32 %v1233_v34 }
 0x894   :  { %v3026_v49 = vpop.eup %3025 }
 0x895   :  { %v1238_v52 = vadd.f32 1.0, %v3026_v49 }
 0x897   :  { %3031 = vrcp.f32 %v1238_v52 }
 0x898   :  { %3033 = vtanh.f32 %v1138_v46 }
 0x89a   :  { %v3028_v51 = vpop.eup %3027 }
 0x89b   :  { %v1145_v53 = vadd.f32 1.0, %v3028_v51  ;;  %v3030_v54 = vpop.eup %3029 }
 0x89d   :  { %3035 = vrcp.f32 %v1145_v53 }
 0x8a1   :  { %v3032_v56 = vpop.eup %3031 }
 0x8a2   :  { %v1241_v58 = vsel %vm3314_vm5, %v3030_v54, %v3032_v56  ;;  %v3034_v63 = vpop.eup %3033 }
 0x8a3   :  { %v1243_v59 = vrot.slane %v1241_v58, 2  ;;  %v1254_v61 = vmul.f32 %v1252_v57, %v1241_v58 }
 0x8a5   :  { %1249 = vrot.lane.b32.xlu0 %v1243_v59, %s3139_s15  ;;  %1245 = vrot.lane.b32.xlu1 %v1243_v59, %s3138_s14 }
 0x8a7   :  { %v3036_v3 = vpop.eup %3035 }
 0x8a8   :  { %v1148_v5 = vsel %vm3314_vm5, %v3034_v63, %v3036_v3 }
 0x8a9   :  { %1153 = vrot.lane.b32.xlu0 %v1148_v5, %s3139_s15  ;;  %1149 = vrot.lane.b32.xlu1 %v1148_v5, %s3138_s14  ;;  %v1155_v25 = vmul.f32 %v1148_v5, %v3562_v19 }
 0x8ad   :  { %1151 = vrot.lane.b32.xlu0 %v1148_v5, %s3137_s2  ;;  %1247 = vrot.lane.b32.xlu1 %v1243_v59, %s3137_s2 }
 0x917   :  { %v1250_v7 = vpop.permute.xlu0 %1249  ;;  %v1246_v10 = vpop.permute.xlu1 %1245 }
 0x918   :  { %v1255_v11 = vmul.f32 %v1250_v7, %v1246_v10 }
 0x91a   :  { %v1257_v15 = vrot.slane %v1255_v11, 6 }
 0x91b   :  { %v1154_v55 = vpop.permute.xlu0 %1153  ;;  %v1150_v21 = vpop.permute.xlu1 %1149 }
 0x91c   :  { %v3612_v24 = vadd.f32 %v1257_v15, %v1254_v61  ;;  %v1156_v27 = vmul.f32 %v1154_v55, %v1150_v21 }
 0x91e   :  { %3037 = vtanh.f32 %v3612_v24  ;;  %v3616_v0 = vadd.f32 %v1156_v27, %v1155_v25  ;;  %v1446_v49 = vrot.slane %v3612_v24, 6 }
 0x91f   :  { %v1152_v32 = vpop.permute.xlu0 %1151  ;;  %v1248_v34 = vpop.permute.xlu1 %1247 }
 0x920   :  { %3039 = vtanh.f32 %v3616_v0 }
 0x928   :  { %v3038_v30 = vpop.eup %3037 }
 0x929   :  { %v1262_v13 = vrot.slane %v3038_v30, 2 }
 0x92a   :  { %v3040_v31 = vpop.eup %3039 }
 0x92b   :  { %v1159_v36 = vmul.f32 %v3040_v31, %v1152_v32  ;;  %v1264_v40 = vmul.f32 %v1262_v13, %v1248_v34 }
 0x92d   :  { %1329 = vmatprep.mubr.f32.mxu0 %v1159_v36  ;;  %2458 = vmatmul.mubr.f32.vlgmr.msra.gmra.mrb[12].mxu1 %v1264_v40 }
 0x92e   :  { %1330 = vmatmul.mubr.f32.vlgmr.msra.gmra.mrb[12].mxu0 %v1264_v40  ;;  %2889 = vmatpush3.bf16.msra.mxu1 %v3215_v6 }
 0x92f   :  { %2858 = vmatpush3.bf16.msra.mxu0 %v3278_v37  ;;  %2890 = vmatprep.subr.bf16.mxu1 %v3134_v1 }
 0x930   :  { %2860 = vmatprep.subr.bf16.mxu0 %v3280_v38  ;;  %2492 = vmatprep.mubr.msk.f32.mxu1 %vm3135_vm0, %v3136_v2 }
 0x932   :  { %2892 = vmatpush3.bf16.msra.mxu1 %v3218_v8 }
 0x933   :  { %2862 = vmatpush3.bf16.msra.mxu0 %v3284_v43  ;;  %2893 = vmatprep.subr.bf16.mxu1 %v3134_v1 }
 0x934   :  { %2864 = vmatprep.subr.bf16.mxu0 %v3287_v44 }
 0x936   :  { %2895 = vmatpush3.bf16.msra.mxu1 %v3231_v14 }
 0x937   :  { %2866 = vmatpush3.bf16.msra.mxu0 %v3290_v47  ;;  %2896 = vmatprep.subr.bf16.mxu1 %v3134_v1 }
 0x938   :  { %2868 = vmatprep.subr.bf16.mxu0 %v3302_v62 }
 0x93a   :  { %2898 = vmatpush3.bf16.msra.mxu1 %v3236_v17 }
 0x93b   :  { %2870 = vmatpush3.bf16.msra.mxu0 %v3304_v4  ;;  %2899 = vmatprep.subr.bf16.mxu1 %v3134_v1 }
 0x93c   :  { %2872 = vmatprep.subr.bf16.mxu0 %v3308_v9 }
 0x93e   :  { %2901 = vmatpush3.bf16.msra.mxu1 %v3240_v20 }
 0x93f   :  { %2874 = vmatpush3.bf16.msra.mxu0 %v3310_v12  ;;  %2902 = vmatprep.subr.bf16.mxu1 %v3134_v1 }
 0x940   :  { %2876 = vmatprep.subr.bf16.mxu0 %v3318_v18 }
 0x942   :  { %2904 = vmatpush3.bf16.msra.mxu1 %v3244_v23 }
 0x943   :  { %2878 = vmatpush3.bf16.msra.mxu0 %v3320_v22  ;;  %2905 = vmatprep.subr.bf16.mxu1 %v3134_v1 }
 0x944   :  { %2880 = vmatprep.subr.bf16.mxu0 %v3323_v28 }
 0x946   :  { %2907 = vmatpush3.bf16.msra.mxu1 %v3248_v26 }
 0x947   :  { %2882 = vmatpush3.bf16.msra.mxu0 %v3326_v35  ;;  %2908 = vmatprep.subr.bf16.mxu1 %v3134_v1 }
 0x948   :  { %2884 = vmatprep.subr.bf16.mxu0 %v3329_v39 }
 0x94a   :  { %2910 = vmatpush3.bf16.msra.mxu1 %v3252_v29 }
 0x94b   :  { %2886 = vmatpush3.bf16.msra.mxu0 %v3336_v45 }
 0x94c   :  { %2912 = vmatprep.subr.bf16.mxu0 %v3276_v33 }
 0xa00   :  { %v1420_v2 = vpop.f32.mrb[12].mxu1 }
 0xa01   :  { %v1425_v6 = vrot.slane %v1420_v2, 4  ;;  %v2103_v8 = vpop.f32.mrb[12].mxu0  ;;  %v2459_v14 = vpop.f32.mrb[13].mxu1 }
 0xa02   :  { %v2104_v17 = vpop.f32.mrb[13].mxu0 }
 0xa03   :  { %v1427_v20 = vadd.f32 %v1425_v6, %v3297_v50  ;;  %v2105_v23 = vadd.f32 %v2104_v17, %v2103_v8 }
 0xa05   :  { %v1785_v26 = vmul.f32 -1.442695, %v1427_v20  ;;  %v1332_v19 = vadd.f32 %v2105_v23, %v3382_v60 }
 0xa07   :  { %3041 = vpow2.f32 %v1785_v26  ;;  %v1784_v1 = vmul.f32 -1.442695, %v1332_v19 }
 0xa09   :  { %3043 = vpow2.f32 %v1784_v1 }
 0xa0a   :  { %3045 = vtanh.f32 %v1427_v20 }
 0xa11   :  { %v3042_v41 = vpop.eup %3041 }
 0xa12   :  { %v1432_v29 = vadd.f32 1.0, %v3042_v41 }
 0xa13   :  { %v3044_v42 = vpop.eup %3043 }
 0xa14   :  { %3047 = vrcp.f32 %v1432_v29  ;;  %v1339_v33 = vadd.f32 1.0, %v3044_v42  ;;  %v3046_v46 = vpop.eup %3045 }
 0xa16   :  { %3049 = vrcp.f32 %v1339_v33 }
 0xa17   :  { %3051 = vtanh.f32 %v1332_v19 }
 0xa1e   :  { %v3048_v48 = vpop.eup %3047 }
 0xa1f   :  { %v1435_v52 = vsel %vm3314_vm5, %v3046_v46, %v3048_v48 }
 0xa20   :  { %v1437_v51 = vrot.slane %v1435_v52, 4  ;;  %v1448_v60 = vmul.f32 %v1446_v49, %v1435_v52  ;;  %v3050_v53 = vpop.eup %3049 }
 0xa21   :  { %v3052_v54 = vpop.eup %3051 }
 0xa22   :  { %1443 = vrot.lane.b32.xlu0 %v1437_v51, %s3139_s15  ;;  %1439 = vrot.lane.b32.xlu1 %v1437_v51, %s3138_s14  ;;  %v1342_v56 = vsel %vm3314_vm5, %v3052_v54, %v3050_v53 }
 0xa23   :  { %v1349_v7 = vmul.f32 %v1342_v56, %v3616_v0 }
 0xa26   :  { %1347 = vrot.lane.b32.xlu0 %v1342_v56, %s3139_s15  ;;  %1343 = vrot.lane.b32.xlu1 %v1342_v56, %s3138_s14 }
 0xa2a   :  { %1345 = vrot.lane.b32.xlu0 %v1342_v56, %s3137_s2  ;;  %1441 = vrot.lane.b32.xlu1 %v1437_v51, %s3137_s2 }
 0xa94   :  { %v1444_v57 = vpop.permute.xlu0 %1443  ;;  %v1440_v58 = vpop.permute.xlu1 %1439 }
 0xa95   :  { %v1449_v59 = vmul.f32 %v1444_v57, %v1440_v58 }
 0xa97   :  { %v1451_v61 = vrot.slane %v1449_v59, 4 }
 0xa98   :  { %v1348_v63 = vpop.permute.xlu0 %1347  ;;  %v1344_v3 = vpop.permute.xlu1 %1343 }
 0xa99   :  { %v1453_v5 = vadd.f32 %v1451_v61, %v1448_v60  ;;  %v1350_v10 = vmul.f32 %v1348_v63, %v1344_v3 }
 0xa9b   :  { %3053 = vtanh.f32 %v1453_v5  ;;  %v3666_v11 = vadd.f32 %v1350_v10, %v1349_v7  ;;  %v1640_v13 = vrot.slane %v1453_v5, 6 }
 0xa9c   :  { %v1346_v24 = vpop.permute.xlu0 %1345  ;;  %v1442_v25 = vpop.permute.xlu1 %1441 }
 0xa9d   :  { %3055 = vtanh.f32 %v3666_v11 }
 0xaa5   :  { %v3054_v15 = vpop.eup %3053 }
 0xaa6   :  { %v1456_v55 = vrot.slane %v3054_v15, 4 }
 0xaa7   :  { %v3056_v21 = vpop.eup %3055 }
 0xaa8   :  { %v1353_v27 = vmul.f32 %v3056_v21, %v1346_v24  ;;  %v1458_v30 = vmul.f32 %v1456_v55, %v1442_v25  ;;  %v1789_v21 = vld [vmem:[%s3716_s6] ss:$0 sm:$0xff] }
 0xaaa   :  { %1523 = vmatprep.mubr.f32.mxu0 %v1353_v27  ;;  %2493 = vmatmul.mubr.f32.vlgmr.msra.gmra.mrb[14].mxu1 %v1458_v30  ;;  %v1790_v27 = vld [vmem:[#allocation2] ss:$0 sm:$0xff] }
 0xaab   :  { %1524 = vmatmul.mubr.f32.vlgmr.msra.gmra.mrb[14].mxu0 %v1458_v30 }
 0xaac   :  { %2914 = vmatpush3.bf16.msra.mxu0 %v3278_v37 }
 0xaad   :  { %2916 = vmatprep.subr.bf16.mxu0 %v3280_v38 }
 0xab0   :  { %2918 = vmatpush3.bf16.msra.mxu0 %v3284_v43 }
 0xab1   :  { %2920 = vmatprep.subr.bf16.mxu0 %v3287_v44 }
 0xab4   :  { %2922 = vmatpush3.bf16.msra.mxu0 %v3290_v47 }
 0xab5   :  { %2924 = vmatprep.subr.bf16.mxu0 %v3302_v62 }
 0xab8   :  { %2926 = vmatpush3.bf16.msra.mxu0 %v3304_v4 }
 0xab9   :  { %2928 = vmatprep.subr.bf16.mxu0 %v3308_v9 }
 0xabc   :  { %2930 = vmatpush3.bf16.msra.mxu0 %v3310_v12  ;;  %v3081_v12 = vld [vmem:[%s3715_s5] ss:$0 sm:$0xff] }
 0xabd   :  { %2932 = vmatprep.subr.bf16.mxu0 %v3318_v18 }
 0xac0   :  { %2934 = vmatpush3.bf16.msra.mxu0 %v3320_v22 }
 0xac1   :  { %2936 = vmatprep.subr.bf16.mxu0 %v3323_v28 }
 0xac4   :  { %2938 = vmatpush3.bf16.msra.mxu0 %v3326_v35 }
 0xac5   :  { %2940 = vmatprep.subr.bf16.mxu0 %v3329_v39 }
 0xac8   :  { %2942 = vmatpush3.bf16.msra.mxu0 %v3336_v45 }
 0xb7d   :  { %v1614_v37 = vpop.f32.mrb[14].mxu1 }
 0xb7e   :  { %v1619_v38 = vrot.slane %v1614_v37, 2  ;;  %v2155_v43 = vpop.f32.mrb[14].mxu0  ;;  %v2494_v44 = vpop.f32.mrb[15].mxu1 }
 0xb7f   :  { %v2156_v47 = vpop.f32.mrb[15].mxu0 }
 0xb80   :  { %v1621_v62 = vadd.f32 %v1619_v38, %v3297_v50  ;;  %v2157_v4 = vadd.f32 %v2156_v47, %v2155_v43 }
 0xb82   :  { %v1787_v9 = vmul.f32 -1.442695, %v1621_v62  ;;  %v1526_v18 = vadd.f32 %v3081_v12, %v2157_v4 }
 0xb84   :  { %3057 = vpow2.f32 %v1787_v9  ;;  %v1786_v22 = vmul.f32 -1.442695, %v1526_v18 }
 0xb86   :  { %3059 = vpow2.f32 %v1786_v22 }
 0xb87   :  { %3061 = vtanh.f32 %v1621_v62 }
 0xb8e   :  { %v3058_v28 = vpop.eup %3057 }
 0xb8f   :  { %v1626_v35 = vadd.f32 1.0, %v3058_v28 }
 0xb90   :  { %v3060_v39 = vpop.eup %3059 }
 0xb91   :  { %3063 = vrcp.f32 %v1626_v35  ;;  %v1533_v45 = vadd.f32 1.0, %v3060_v39  ;;  %v3062_v0 = vpop.eup %3061 }
 0xb93   :  { %3065 = vrcp.f32 %v1533_v45 }
 0xb94   :  { %3067 = vtanh.f32 %v1526_v18 }
 0xb9b   :  { %v3064_v50 = vpop.eup %3063 }
 0xb9c   :  { %v1629_v31 = vsel %vm3314_vm5, %v3062_v0, %v3064_v50 }
 0xb9d   :  { %v1631_v32 = vrot.slane %v1629_v31, 6  ;;  %v1642_v34 = vmul.f32 %v1640_v13, %v1629_v31  ;;  %v3066_v36 = vpop.eup %3065 }
 0xb9e   :  { %v3068_v40 = vpop.eup %3067 }
 0xb9f   :  { %1637 = vrot.lane.b32.xlu0 %v1631_v32, %s3139_s15  ;;  %1633 = vrot.lane.b32.xlu1 %v1631_v32, %s3138_s14  ;;  %v1536_v2 = vsel %vm3314_vm5, %v3068_v40, %v3066_v36 }
 0xba0   :  { %v1543_v19 = vmul.f32 %v1536_v2, %v3666_v11 }
 0xba3   :  { %1541 = vrot.lane.b32.xlu0 %v1536_v2, %s3139_s15  ;;  %1537 = vrot.lane.b32.xlu1 %v1536_v2, %s3138_s14 }
 0xba7   :  { %1635 = vrot.lane.b32.xlu0 %v1631_v32, %s3137_s2  ;;  %1539 = vrot.lane.b32.xlu1 %v1536_v2, %s3137_s2 }
 0xc11   :  { %v1638_v6 = vpop.permute.xlu0 %1637  ;;  %v1634_v8 = vpop.permute.xlu1 %1633 }
 0xc12   :  { %v1643_v14 = vmul.f32 %v1638_v6, %v1634_v8 }
 0xc14   :  { %v1645_v17 = vrot.slane %v1643_v14, 2 }
 0xc15   :  { %v1542_v20 = vpop.permute.xlu0 %1541  ;;  %v1538_v23 = vpop.permute.xlu1 %1537 }
 0xc16   :  { %v1647_v26 = vadd.f32 %v1645_v17, %v1642_v34  ;;  %v1544_v1 = vmul.f32 %v1542_v20, %v1538_v23 }
 0xc18   :  { %3069 = vtanh.f32 %v1647_v26  ;;  %v1545_v41 = vadd.f32 %v1544_v1, %v1543_v19 }
 0xc19   :  { %v1636_v46 = vpop.permute.xlu0 %1635  ;;  %v1540_v48 = vpop.permute.xlu1 %1539 }
 0xc1a   :  { %3071 = vtanh.f32 %v1545_v41 }
 0xc22   :  { %v3070_v29 = vpop.eup %3069 }
 0xc23   :  { %v1650_v42 = vrot.slane %v3070_v29, 6 }
 0xc24   :  { %v3072_v33 = vpop.eup %3071 }
 0xc25   :  { %v1652_v49 = vmul.f32 %v1650_v42, %v1636_v46  ;;  %v1547_v52 = vmul.f32 %v3072_v33, %v1540_v48 }
 0xc27   :  { %1717 = vmatprep.mubr.f32.mxu0 %v1547_v52 }
 0xc28   :  { %1718 = vmatmul.mubr.f32.vlgmr.msra.gmra.mrb[16].mxu0 %v1652_v49 }
 0xcfb   :  { %v2207_v51 = vpop.f32.mrb[16].mxu0 }
 0xcfc   :  { %v2208_v60 = vpop.f32.mrb[17].mxu0 }
 0xcfd   :  { %v2209_v53 = vadd.f32 %v2208_v60, %v2207_v51 }
 0xcff   :  { %v1720_v54 = vadd.f32 %v3081_v12, %v2209_v53 }
 0xd01   :  { %v1788_v56 = vmul.f32 -1.442695, %v1720_v54 }
 0xd03   :  { %3073 = vpow2.f32 %v1788_v56 }
 0xd04   :  { %3075 = vtanh.f32 %v1720_v54 }
 0xd0d   :  { %v3074_v57 = vpop.eup %3073 }
 0xd0e   :  { %v1727_v58 = vadd.f32 1.0, %v3074_v57  ;;  %v3076_v59 = vpop.eup %3075 }
 0xd10   :  { %3077 = vrcp.f32 %v1727_v58 }
 0xd1a   :  { %v3078_v61 = vpop.eup %3077 }
 0xd1b   :  { %v1730_v63 = vsel %vm3314_vm5, %v3076_v59, %v3078_v61 }
 0xd1c   :  { %1735 = vrot.lane.b32.xlu0 %v1730_v63, %s3139_s15  ;;  %1731 = vrot.lane.b32.xlu1 %v1730_v63, %s3138_s14  ;;  %v1737_v7 = vmul.f32 %v1730_v63, %v1545_v41 }
 0xd20   :  { %1733 = vrot.lane.b32.xlu1 %v1730_v63, %s3137_s2 }
 0xd8e   :  { %v1736_v3 = vpop.permute.xlu0 %1735  ;;  %v1732_v5 = vpop.permute.xlu1 %1731 }
 0xd8f   :  { %v1738_v10 = vmul.f32 %v1736_v3, %v1732_v5 }
 0xd91   :  { %v1739_v11 = vadd.f32 %v1738_v10, %v1737_v7 }
 0xd92   :  { %v1734_v55 = vpop.permute.xlu1 %1733 }
 0xd93   :  { %3079 = vtanh.f32 %v1739_v11 }
 0xd9d   :  { %v3080_v15 = vpop.eup %3079 }
 0xd9e   :  { %v1741_v16 = vmul.f32 %v3080_v15, %v1734_v55 }
 0xda0   :  { %v1748_v24 = vmul.f32 %v1789_v21, %v1741_v16 }
 0xda2   :  { %v1750_v25 = vsel %vm1749_vm6, %v1748_v24, 0.0 }
 0xda3   :  { %1751 = vadd.xlane.f32.xlu0 %v1750_v25 }
 0xe30   :  { %v1752_v30 = vpop.xlane.xlu0 %1751 }
 0xe31   :  { %v1759_v37 = vadd.f32 %v1790_v27, %v1752_v30 }
 0xe33   :  { %1761 = vst.msk [vmem:[%s3718_s8] sm:$0x3] %vm1760_vm7, %v1759_v37 }
 0xe34   :  { %1766 = vsyncpa [#allocation4], 1 }
 0xe35   :  { %1767 = vsyncpa [#allocation6], 1 }

</bundles_post_ra>
